<compile_context>
chip_gen: v6e
topology: v6e:2x2x1
jax: 0.10.0
libtpu: 0.0.40
codegen_flags: <defaults>
</compile_context>

<pallas_src>
import functools

import jax
import jax.numpy as jnp
from jax.experimental import pallas as pl
from jax.experimental.pallas import tpu as pltpu

EPS = 1e-9
VMEM_LIMIT_BYTES = 32 * 1024 * 1024   # fits v7x (64 MiB) as well as v5e/v6e


# ----------------------------------------------------------------------------
# In-kernel helpers
# ----------------------------------------------------------------------------
def _layer_norm(y, scale, offset):
    """Custom LayerNormalization: unbiased std (ddof=1), eps added to std."""
    d = y.shape[-1]
    mean = jnp.mean(y, axis=-1, keepdims=True)
    c = y - mean
    var_u = jnp.sum(c * c, axis=-1, keepdims=True) / (d - 1)
    inv = pl.reciprocal(jnp.sqrt(var_u) + EPS, approx=True)   # EUP slot, ~free
    return scale * c * inv + offset


def _attend(hq, hk, hv, inv_temp):
    """softmax((hq*inv_temp) hk^T) hv; f32 in/out, bf16 MXU operands."""
    hq_b = (hq * inv_temp).astype(jnp.bfloat16)        # scale Q, not the logits
    logits = jax.lax.dot_general(
        hq_b, hk.astype(jnp.bfloat16), (((1,), (1,)), ((), ())),
        preferred_element_type=jnp.float32)                          # (Lq, Lk)
    logits = logits - jnp.max(logits, axis=-1, keepdims=True)
    p = jnp.exp(logits)
    p = p * pl.reciprocal(jnp.sum(p, axis=-1, keepdims=True), approx=True)
    return jnp.dot(p.astype(jnp.bfloat16), hv.astype(jnp.bfloat16),
                   preferred_element_type=jnp.float32)               # (Lq, d_v)


def _mha_from_projected(q_heads, kv_heads, residual, wp, scale, offset,
                        *, n_heads, d_k, d_v, inv_temp):
    """q_heads: (Lq, H*d_k); kv_heads: (Lk, H*d_k | H*d_v); residual: (Lq, D)."""
    v_off = n_heads * d_k
    heads = []
    for h in range(n_heads):                       # static unroll; per-head work
        hq = q_heads[:, h * d_k:(h + 1) * d_k]     # is only logits/softmax/PV
        hk = kv_heads[:, h * d_k:(h + 1) * d_k]
        hv = kv_heads[:, v_off + h * d_v: v_off + (h + 1) * d_v]
        heads.append(_attend(hq, hk, hv, inv_temp))
    concat = jnp.concatenate(heads, axis=-1)                         # (Lq, H*d_v)
    proj = jnp.dot(concat.astype(jnp.bfloat16), wp,
                   preferred_element_type=jnp.float32)               # (Lq, D)
    return _layer_norm(proj + residual, scale, offset)


# ----------------------------------------------------------------------------
# Fused DecoderLayer kernel: one batch element per grid step
# ----------------------------------------------------------------------------
def decoder_layer_kernel(dec_ref, enc_ref,
                         wqkv_y_ref, wp_y_ref, sc_y_ref, of_y_ref,
                         wq_x_ref, wkv_x_ref, wp_x_ref, sc_x_ref, of_x_ref,
                         w1_ref, w2_ref, sc_f_ref, of_f_ref,
                         o_ref, *, n_heads, d_k, d_v, inv_temp):
    # ---- self-attention (q = k = v = dec_input), fused QKV GEMM ----
    x0 = dec_ref[0].astype(jnp.float32)                              # (Ly, D)
    qkv = jnp.dot(x0.astype(jnp.bfloat16), wqkv_y_ref[...],
                  preferred_element_type=jnp.float32)        # (Ly, H*(2dk+dv))
    nq = n_heads * d_k
    x1 = _mha_from_projected(qkv[:, :nq], qkv[:, nq:], x0, wp_y_ref[...],
                             sc_y_ref[...], of_y_ref[...],
                             n_heads=n_heads, d_k=d_k, d_v=d_v,
                             inv_temp=inv_temp)                      # (Ly, D) f32

    # ---- cross-attention (q = self-attn out, k = v = enc_output) ----
    enc_b = enc_ref[0].astype(jnp.bfloat16)                          # (Lx, D)
    q_x = jnp.dot(x1.astype(jnp.bfloat16), wq_x_ref[...],
                  preferred_element_type=jnp.float32)                # (Ly, H*dk)
    kv_x = jnp.dot(enc_b, wkv_x_ref[...],
                   preferred_element_type=jnp.float32)       # (Lx, H*(dk+dv))
    x2 = _mha_from_projected(q_x, kv_x, x1, wp_x_ref[...],
                             sc_x_ref[...], of_x_ref[...],
                             n_heads=n_heads, d_k=d_k, d_v=d_v,
                             inv_temp=inv_temp)                      # (Ly, D) f32

    # ---- positionwise feed-forward (dropout identity in eval) ----
    h = jnp.dot(x2.astype(jnp.bfloat16), w1_ref[...],
                preferred_element_type=jnp.float32)                  # (Ly, d_inner)
    h = jnp.maximum(h, 0.0)
    y = jnp.dot(h.astype(jnp.bfloat16), w2_ref[...],
                preferred_element_type=jnp.float32)                  # (Ly, D)
    out = _layer_norm(y + x2, sc_f_ref[...], of_f_ref[...])
    # TODO(synk): lane-dense (rows*D/128, 128) output slab for production sizes;
    # at d_model=32 this is a masked partial vst.
    o_ref[0] = out.astype(o_ref.dtype)


# ----------------------------------------------------------------------------
# One-time parameter repack (concat per-head weights, cast to bf16)
# ----------------------------------------------------------------------------
def prepare_decoder_params(y_attn_params, x_attn_params, ff_params):
    """Repack per-head weights into wide GEMM matrices and cast to bf16 ONCE
    so the per-forward path carries no astype / extra HBM traffic."""
    def flat_heads(w):                        # (H, D, d) -> (D, H*d)
        H, D, d = w.shape
        return jnp.transpose(w, (1, 0, 2)).reshape(D, H * d)

    wq_y, wk_y, wv_y, wp_y, sc_y, of_y = y_attn_params
    wq_x, wk_x, wv_x, wp_x, sc_x, of_x = x_attn_params
    w1, w2, sc_f, of_f = ff_params
    d_model = w1.shape[0]
    bf = lambda a: a.astype(jnp.bfloat16)

    return dict(
        # self-attn: fused QKV ([q heads | k heads | v heads]) + proj
        wqkv_y=bf(jnp.concatenate([flat_heads(wq_y), flat_heads(wk_y),
                                   flat_heads(wv_y)], axis=1)),
        wp_y=bf(wp_y.reshape(-1, d_model)),
        sc_y=sc_y.reshape(1, d_model), of_y=of_y.reshape(1, d_model),
        # cross-attn: Q from decoder stream, fused KV from encoder stream
        wq_x=bf(flat_heads(wq_x)),
        wkv_x=bf(jnp.concatenate([flat_heads(wk_x), flat_heads(wv_x)], axis=1)),
        wp_x=bf(wp_x.reshape(-1, d_model)),
        sc_x=sc_x.reshape(1, d_model), of_x=of_x.reshape(1, d_model),
        # feed-forward
        w1=bf(w1), w2=bf(w2),
        sc_f=sc_f.reshape(1, d_model), of_f=of_f.reshape(1, d_model),
        n_heads=int(wq_y.shape[0]), d_k=int(wq_y.shape[2]),
        d_v=int(wv_y.shape[2]),
    )


# ----------------------------------------------------------------------------
# DecoderLayer forward (single fused pallas_call)
# ----------------------------------------------------------------------------
def decoder_layer(dec_input, enc_output, params):
    # TODO(synk): attn_mask (masked_fill -inf) and the n_corrupts>0
    # repeat/average path are not implemented; matches forward defaults
    # (attn_mask=None, n_corrupts=0). Dropout is identity (eval / p=0).
    batch, len_y, d_model = dec_input.shape
    _, len_x, _ = enc_output.shape

    kern = functools.partial(
        decoder_layer_kernel,
        n_heads=params["n_heads"], d_k=params["d_k"], d_v=params["d_v"],
        inv_temp=1.0 / (d_model ** 0.5))

    def w_spec(shape):
        return pl.BlockSpec(shape, lambda b, _s=shape: (0,) * len(_s))

    weight_keys = ("wqkv_y", "wp_y", "sc_y", "of_y",
                   "wq_x", "wkv_x", "wp_x", "sc_x", "of_x",
                   "w1", "w2", "sc_f", "of_f")

    return pl.pallas_call(
        kern,
        out_shape=jax.ShapeDtypeStruct((batch, len_y, d_model), dec_input.dtype),
        grid_spec=pltpu.PrefetchScalarGridSpec(
            num_scalar_prefetch=0,
            grid=(batch,),   # >= 2 steps when batch >= 2 -> feeds both v7x TCs
            in_specs=[
                pl.BlockSpec((1, len_y, d_model), lambda b: (b, 0, 0)),   # dec
                pl.BlockSpec((1, len_x, d_model), lambda b: (b, 0, 0)),   # enc
            ] + [w_spec(params[k].shape) for k in weight_keys],
            out_specs=pl.BlockSpec((1, len_y, d_model), lambda b: (b, 0, 0)),
        ),
        compiler_params=pltpu.CompilerParams(
            dimension_semantics=("parallel",),
            vmem_limit_bytes=VMEM_LIMIT_BYTES),
    )(dec_input, enc_output, *(params[k] for k in weight_keys))


# ----------------------------------------------------------------------------
# Pure-JAX f32 reference (same math as the torch module)
# ----------------------------------------------------------------------------
def _ref_ln(y, scale, offset):
    mean = y.mean(-1, keepdims=True)
    c = y - mean
    std = jnp.sqrt((c * c).sum(-1, keepdims=True) / (y.shape[-1] - 1))
    return scale * c / (std + EPS) + offset


def _ref_mha(q, k, v, wq, wk, wv, wp, scale, offset):
    d_model = q.shape[-1]
    proj = 0.0
    for h in range(wq.shape[0]):
        hq, hk, hv = q @ wq[h], k @ wk[h], v @ wv[h]
        logits = jnp.einsum('bqd,bkd->bqk', hq, hk) / (d_model ** 0.5)
        p = jax.nn.softmax(logits, axis=-1)
        head = jnp.einsum('bqk,bkd->bqd', p, hv)
        proj = proj + head @ wp[h]
    return _ref_ln(proj + q, scale, offset)


def _ref_ff(x, w1, w2, scale, offset):
    y = jnp.maximum(x @ w1, 0.0) @ w2 + x
    return _ref_ln(y, scale, offset)


# ----------------------------------------------------------------------------
if __name__ == "__main__":
    # hparams: d_model=32, d_inner=64, n_heads=2, d_k=d_v=16, dropout=0 (eval),
    # init_range=0.1. dec len 8, enc len 16.
    batch, y_len, enc_len = 2, 8, 16
    d_model, d_inner, n_heads, d_k, d_v = 32, 64, 2, 16, 16
    init_range = 0.1

    key = jax.random.PRNGKey(0)
    ks = jax.random.split(key, 12)

    def uni(k, shape):
        return jax.random.uniform(k, shape, jnp.float32,
                                  minval=-init_range, maxval=init_range)

    dec_input = jax.random.normal(ks[0], (batch, y_len, d_model), jnp.float32)
    enc_output = jax.random.normal(ks[1], (batch, enc_len, d_model), jnp.float32)

    # nn.Linear stores (out, in); we keep pre-transposed (in, out) layouts,
    # stacked per head: Wq/Wk: (H, D, d_k), Wv: (H, D, d_v), Wproj: (H, d_v, D).
    ln_scale = jnp.ones((d_model,), jnp.float32)
    ln_offset = jnp.zeros((d_model,), jnp.float32)

    y_attn_params = (uni(ks[2], (n_heads, d_model, d_k)),
                     uni(ks[3], (n_heads, d_model, d_k)),
                     uni(ks[4], (n_heads, d_model, d_v)),
                     uni(ks[5], (n_heads, d_v, d_model)),
                     ln_scale, ln_offset)
    x_attn_params = (uni(ks[6], (n_heads, d_model, d_k)),
                     uni(ks[7], (n_heads, d_model, d_k)),
                     uni(ks[8], (n_heads, d_model, d_v)),
                     uni(ks[9], (n_heads, d_v, d_model)),
                     ln_scale, ln_offset)
    ff_params = (uni(ks[10], (d_model, d_inner)),
                 uni(ks[11], (d_inner, d_model)),
                 ln_scale, ln_offset)

    # one-time weight repack + bf16 cast (outside the per-forward path)
    params = prepare_decoder_params(y_attn_params, x_attn_params, ff_params)

    out = decoder_layer(dec_input, enc_output, params)
    jax.block_until_ready(out)

    # pure-JAX f32 reference of the same forward math
    ref = _ref_mha(dec_input, dec_input, dec_input, *y_attn_params)
    ref = _ref_mha(ref, enc_output, enc_output, *x_attn_params)
    ref = _ref_ff(ref, *ff_params)

    # bf16 GEMM operands (f32 accumulation) -> looser tolerance than pure f32
    assert jnp.allclose(out, ref, atol=1e-2, rtol=1e-2), \
        float(jnp.max(jnp.abs(out - ref)))

    print("KERNEL_OK")
</pallas_src>

<mosaic_0001>
module attributes {stable_mosaic.version = 11 : i64} {
  func.func @decoder_layer_kernel(%arg0: i32, %arg1: memref<1x8x32xf32, #tpu.memory_space<vmem>>, %arg2: memref<1x16x32xf32, #tpu.memory_space<vmem>>, %arg3: memref<32x96xbf16, #tpu.memory_space<vmem>>, %arg4: memref<32x32xbf16, #tpu.memory_space<vmem>>, %arg5: memref<1x32xf32, #tpu.memory_space<vmem>>, %arg6: memref<1x32xf32, #tpu.memory_space<vmem>>, %arg7: memref<32x32xbf16, #tpu.memory_space<vmem>>, %arg8: memref<32x64xbf16, #tpu.memory_space<vmem>>, %arg9: memref<32x32xbf16, #tpu.memory_space<vmem>>, %arg10: memref<1x32xf32, #tpu.memory_space<vmem>>, %arg11: memref<1x32xf32, #tpu.memory_space<vmem>>, %arg12: memref<32x64xbf16, #tpu.memory_space<vmem>>, %arg13: memref<64x32xbf16, #tpu.memory_space<vmem>>, %arg14: memref<1x32xf32, #tpu.memory_space<vmem>>, %arg15: memref<1x32xf32, #tpu.memory_space<vmem>>, %arg16: memref<1x8x32xf32, #tpu.memory_space<vmem>>) attributes {dimension_semantics = [#tpu.dimension_semantics<parallel>], iteration_bounds = array<i64: 2>, scalar_prefetch = 0 : i64, scratch_operands = 0 : i64, tpu.core_type = #tpu.core_type<tc>, window_params = [{transform_indices = @transform_0, window_bounds = array<i64: 1, 8, 32>}, {transform_indices = @transform_1, window_bounds = array<i64: 1, 16, 32>}, {pipeline_mode = #tpu.pipeline_mode<synchronous>, transform_indices = @transform_2, window_bounds = array<i64: 32, 96>}, {pipeline_mode = #tpu.pipeline_mode<synchronous>, transform_indices = @transform_3, window_bounds = array<i64: 32, 32>}, {pipeline_mode = #tpu.pipeline_mode<synchronous>, transform_indices = @transform_4, window_bounds = array<i64: 1, 32>}, {pipeline_mode = #tpu.pipeline_mode<synchronous>, transform_indices = @transform_5, window_bounds = array<i64: 1, 32>}, {pipeline_mode = #tpu.pipeline_mode<synchronous>, transform_indices = @transform_6, window_bounds = array<i64: 32, 32>}, {pipeline_mode = #tpu.pipeline_mode<synchronous>, transform_indices = @transform_7, window_bounds = array<i64: 32, 64>}, {pipeline_mode = #tpu.pipeline_mode<synchronous>, transform_indices = @transform_8, window_bounds = array<i64: 32, 32>}, {pipeline_mode = #tpu.pipeline_mode<synchronous>, transform_indices = @transform_9, window_bounds = array<i64: 1, 32>}, {pipeline_mode = #tpu.pipeline_mode<synchronous>, transform_indices = @transform_10, window_bounds = array<i64: 1, 32>}, {pipeline_mode = #tpu.pipeline_mode<synchronous>, transform_indices = @transform_11, window_bounds = array<i64: 32, 64>}, {pipeline_mode = #tpu.pipeline_mode<synchronous>, transform_indices = @transform_12, window_bounds = array<i64: 64, 32>}, {pipeline_mode = #tpu.pipeline_mode<synchronous>, transform_indices = @transform_13, window_bounds = array<i64: 1, 32>}, {pipeline_mode = #tpu.pipeline_mode<synchronous>, transform_indices = @transform_14, window_bounds = array<i64: 1, 32>}, {transform_indices = @transform_15, window_bounds = array<i64: 1, 8, 32>}]} {
    %c0 = arith.constant 0 : index
    %c0_0 = arith.constant 0 : index
    %c0_1 = arith.constant 0 : index
    %0 = vector.load %arg1[%c0, %c0_0, %c0_1] : memref<1x8x32xf32, #tpu.memory_space<vmem>>, vector<1x8x32xf32>
    %1 = vector.shape_cast %0 : vector<1x8x32xf32> to vector<8x32xf32>
    %2 = arith.truncf %1 : vector<8x32xf32> to vector<8x32xbf16>
    %c0_2 = arith.constant 0 : index
    %c0_3 = arith.constant 0 : index
    %3 = vector.load %arg3[%c0_2, %c0_3] : memref<32x96xbf16, #tpu.memory_space<vmem>>, vector<32x96xbf16>
    %cst = arith.constant dense<0.000000e+00> : vector<8x96xf32>
    %4 = tpu.matmul %2, %3, %cst {dimension_numbers = #tpu.dot_dimension_numbers<[1], [0], [0], [1], [0, 0, 1, 1], [], []>} : vector<8x32xbf16>, vector<32x96xbf16>, vector<8x96xf32> -> vector<8x96xf32>
    %5 = vector.extract_strided_slice %4 {offsets = [0, 0], sizes = [8, 32], strides = [1, 1]} : vector<8x96xf32> to vector<8x32xf32>
    %6 = vector.extract_strided_slice %4 {offsets = [0, 32], sizes = [8, 64], strides = [1, 1]} : vector<8x96xf32> to vector<8x64xf32>
    %c0_4 = arith.constant 0 : index
    %c0_5 = arith.constant 0 : index
    %7 = vector.load %arg4[%c0_4, %c0_5] : memref<32x32xbf16, #tpu.memory_space<vmem>>, vector<32x32xbf16>
    %c0_6 = arith.constant 0 : index
    %c0_7 = arith.constant 0 : index
    %8 = vector.load %arg5[%c0_6, %c0_7] : memref<1x32xf32, #tpu.memory_space<vmem>>, vector<1x32xf32>
    %c0_8 = arith.constant 0 : index
    %c0_9 = arith.constant 0 : index
    %9 = vector.load %arg6[%c0_8, %c0_9] : memref<1x32xf32, #tpu.memory_space<vmem>>, vector<1x32xf32>
    %10 = vector.extract_strided_slice %5 {offsets = [0, 0], sizes = [8, 16], strides = [1, 1]} : vector<8x32xf32> to vector<8x16xf32>
    %11 = vector.extract_strided_slice %6 {offsets = [0, 0], sizes = [8, 16], strides = [1, 1]} : vector<8x64xf32> to vector<8x16xf32>
    %12 = vector.extract_strided_slice %6 {offsets = [0, 32], sizes = [8, 16], strides = [1, 1]} : vector<8x64xf32> to vector<8x16xf32>
    %cst_10 = arith.constant 0.176776692 : f32
    %13 = vector.broadcast %cst_10 : f32 to vector<8x16xf32>
    %14 = arith.mulf %10, %13 : vector<8x16xf32>
    %15 = arith.truncf %14 : vector<8x16xf32> to vector<8x16xbf16>
    %16 = arith.truncf %11 : vector<8x16xf32> to vector<8x16xbf16>
    %cst_11 = arith.constant dense<0.000000e+00> : vector<8x8xf32>
    %17 = tpu.matmul %15, %16, %cst_11 {dimension_numbers = #tpu.dot_dimension_numbers<[1], [1], [0], [0], [0, 0, 1, 0], [], []>} : vector<8x16xbf16>, vector<8x16xbf16>, vector<8x8xf32> -> vector<8x8xf32>
    %cst_12 = arith.constant dense<0xFF800000> : vector<8xf32>
    %18 = vector.multi_reduction <maximumf>, %17, %cst_12 [1] : vector<8x8xf32> to vector<8xf32>
    %19 = vector.shape_cast %18 : vector<8xf32> to vector<8x1xf32>
    %20 = vector.broadcast %19 : vector<8x1xf32> to vector<8x8xf32>
    %21 = arith.subf %17, %20 : vector<8x8xf32>
    %22 = math.exp %21 : vector<8x8xf32>
    %cst_13 = arith.constant dense<0.000000e+00> : vector<8xf32>
    %23 = vector.multi_reduction <add>, %22, %cst_13 [1] : vector<8x8xf32> to vector<8xf32>
    %24 = vector.shape_cast %23 : vector<8xf32> to vector<8x1xf32>
    %25 = tpu.reciprocal %24 {approx = true} : vector<8x1xf32> -> vector<8x1xf32>
    %26 = vector.broadcast %25 : vector<8x1xf32> to vector<8x8xf32>
    %27 = arith.mulf %22, %26 : vector<8x8xf32>
    %28 = arith.truncf %27 : vector<8x8xf32> to vector<8x8xbf16>
    %29 = arith.truncf %12 : vector<8x16xf32> to vector<8x16xbf16>
    %cst_14 = arith.constant dense<0.000000e+00> : vector<8x16xf32>
    %30 = tpu.matmul %28, %29, %cst_14 {dimension_numbers = #tpu.dot_dimension_numbers<[1], [0], [0], [1], [0, 0, 1, 1], [], []>} : vector<8x8xbf16>, vector<8x16xbf16>, vector<8x16xf32> -> vector<8x16xf32>
    %31 = vector.extract_strided_slice %5 {offsets = [0, 16], sizes = [8, 16], strides = [1, 1]} : vector<8x32xf32> to vector<8x16xf32>
    %32 = vector.extract_strided_slice %6 {offsets = [0, 16], sizes = [8, 16], strides = [1, 1]} : vector<8x64xf32> to vector<8x16xf32>
    %33 = vector.extract_strided_slice %6 {offsets = [0, 48], sizes = [8, 16], strides = [1, 1]} : vector<8x64xf32> to vector<8x16xf32>
    %cst_15 = arith.constant 0.176776692 : f32
    %34 = vector.broadcast %cst_15 : f32 to vector<8x16xf32>
    %35 = arith.mulf %31, %34 : vector<8x16xf32>
    %36 = arith.truncf %35 : vector<8x16xf32> to vector<8x16xbf16>
    %37 = arith.truncf %32 : vector<8x16xf32> to vector<8x16xbf16>
    %cst_16 = arith.constant dense<0.000000e+00> : vector<8x8xf32>
    %38 = tpu.matmul %36, %37, %cst_16 {dimension_numbers = #tpu.dot_dimension_numbers<[1], [1], [0], [0], [0, 0, 1, 0], [], []>} : vector<8x16xbf16>, vector<8x16xbf16>, vector<8x8xf32> -> vector<8x8xf32>
    %cst_17 = arith.constant dense<0xFF800000> : vector<8xf32>
    %39 = vector.multi_reduction <maximumf>, %38, %cst_17 [1] : vector<8x8xf32> to vector<8xf32>
    %40 = vector.shape_cast %39 : vector<8xf32> to vector<8x1xf32>
    %41 = vector.broadcast %40 : vector<8x1xf32> to vector<8x8xf32>
    %42 = arith.subf %38, %41 : vector<8x8xf32>
    %43 = math.exp %42 : vector<8x8xf32>
    %cst_18 = arith.constant dense<0.000000e+00> : vector<8xf32>
    %44 = vector.multi_reduction <add>, %43, %cst_18 [1] : vector<8x8xf32> to vector<8xf32>
    %45 = vector.shape_cast %44 : vector<8xf32> to vector<8x1xf32>
    %46 = tpu.reciprocal %45 {approx = true} : vector<8x1xf32> -> vector<8x1xf32>
    %47 = vector.broadcast %46 : vector<8x1xf32> to vector<8x8xf32>
    %48 = arith.mulf %43, %47 : vector<8x8xf32>
    %49 = arith.truncf %48 : vector<8x8xf32> to vector<8x8xbf16>
    %50 = arith.truncf %33 : vector<8x16xf32> to vector<8x16xbf16>
    %cst_19 = arith.constant dense<0.000000e+00> : vector<8x16xf32>
    %51 = tpu.matmul %49, %50, %cst_19 {dimension_numbers = #tpu.dot_dimension_numbers<[1], [0], [0], [1], [0, 0, 1, 1], [], []>} : vector<8x8xbf16>, vector<8x16xbf16>, vector<8x16xf32> -> vector<8x16xf32>
    %52 = tpu.concatenate %30, %51 in 1 : vector<8x16xf32>, vector<8x16xf32> -> vector<8x32xf32>
    %53 = arith.truncf %52 : vector<8x32xf32> to vector<8x32xbf16>
    %cst_20 = arith.constant dense<0.000000e+00> : vector<8x32xf32>
    %54 = tpu.matmul %53, %7, %cst_20 {dimension_numbers = #tpu.dot_dimension_numbers<[1], [0], [0], [1], [0, 0, 1, 1], [], []>} : vector<8x32xbf16>, vector<32x32xbf16>, vector<8x32xf32> -> vector<8x32xf32>
    %55 = arith.addf %54, %1 : vector<8x32xf32>
    %cst_21 = arith.constant dense<0.000000e+00> : vector<8xf32>
    %56 = vector.multi_reduction <add>, %55, %cst_21 [1] : vector<8x32xf32> to vector<8xf32>
    %57 = vector.shape_cast %56 : vector<8xf32> to vector<8x1xf32>
    %cst_22 = arith.constant 3.200000e+01 : f32
    %58 = vector.broadcast %cst_22 : f32 to vector<8x1xf32>
    %59 = arith.divf %57, %58 : vector<8x1xf32>
    %60 = vector.broadcast %59 : vector<8x1xf32> to vector<8x32xf32>
    %61 = arith.subf %55, %60 : vector<8x32xf32>
    %62 = arith.mulf %61, %61 : vector<8x32xf32>
    %cst_23 = arith.constant dense<0.000000e+00> : vector<8xf32>
    %63 = vector.multi_reduction <add>, %62, %cst_23 [1] : vector<8x32xf32> to vector<8xf32>
    %64 = vector.shape_cast %63 : vector<8xf32> to vector<8x1xf32>
    %cst_24 = arith.constant 3.100000e+01 : f32
    %65 = vector.broadcast %cst_24 : f32 to vector<8x1xf32>
    %66 = arith.divf %64, %65 : vector<8x1xf32>
    %67 = math.sqrt %66 : vector<8x1xf32>
    %cst_25 = arith.constant 9.99999971E-10 : f32
    %68 = vector.broadcast %cst_25 : f32 to vector<8x1xf32>
    %69 = arith.addf %67, %68 : vector<8x1xf32>
    %70 = tpu.reciprocal %69 {approx = true} : vector<8x1xf32> -> vector<8x1xf32>
    %71 = vector.broadcast %8 : vector<1x32xf32> to vector<8x32xf32>
    %72 = arith.mulf %71, %61 : vector<8x32xf32>
    %73 = vector.broadcast %70 : vector<8x1xf32> to vector<8x32xf32>
    %74 = arith.mulf %72, %73 : vector<8x32xf32>
    %75 = vector.broadcast %9 : vector<1x32xf32> to vector<8x32xf32>
    %76 = arith.addf %74, %75 : vector<8x32xf32>
    %c0_26 = arith.constant 0 : index
    %c0_27 = arith.constant 0 : index
    %c0_28 = arith.constant 0 : index
    %77 = vector.load %arg2[%c0_26, %c0_27, %c0_28] : memref<1x16x32xf32, #tpu.memory_space<vmem>>, vector<1x16x32xf32>
    %78 = vector.shape_cast %77 : vector<1x16x32xf32> to vector<16x32xf32>
    %79 = arith.truncf %78 : vector<16x32xf32> to vector<16x32xbf16>
    %80 = arith.truncf %76 : vector<8x32xf32> to vector<8x32xbf16>
    %c0_29 = arith.constant 0 : index
    %c0_30 = arith.constant 0 : index
    %81 = vector.load %arg7[%c0_29, %c0_30] : memref<32x32xbf16, #tpu.memory_space<vmem>>, vector<32x32xbf16>
    %cst_31 = arith.constant dense<0.000000e+00> : vector<8x32xf32>
    %82 = tpu.matmul %80, %81, %cst_31 {dimension_numbers = #tpu.dot_dimension_numbers<[1], [0], [0], [1], [0, 0, 1, 1], [], []>} : vector<8x32xbf16>, vector<32x32xbf16>, vector<8x32xf32> -> vector<8x32xf32>
    %c0_32 = arith.constant 0 : index
    %c0_33 = arith.constant 0 : index
    %83 = vector.load %arg8[%c0_32, %c0_33] : memref<32x64xbf16, #tpu.memory_space<vmem>>, vector<32x64xbf16>
    %cst_34 = arith.constant dense<0.000000e+00> : vector<16x64xf32>
    %84 = tpu.matmul %79, %83, %cst_34 {dimension_numbers = #tpu.dot_dimension_numbers<[1], [0], [0], [1], [0, 0, 1, 1], [], []>} : vector<16x32xbf16>, vector<32x64xbf16>, vector<16x64xf32> -> vector<16x64xf32>
    %c0_35 = arith.constant 0 : index
    %c0_36 = arith.constant 0 : index
    %85 = vector.load %arg9[%c0_35, %c0_36] : memref<32x32xbf16, #tpu.memory_space<vmem>>, vector<32x32xbf16>
    %c0_37 = arith.constant 0 : index
    %c0_38 = arith.constant 0 : index
    %86 = vector.load %arg10[%c0_37, %c0_38] : memref<1x32xf32, #tpu.memory_space<vmem>>, vector<1x32xf32>
    %c0_39 = arith.constant 0 : index
    %c0_40 = arith.constant 0 : index
    %87 = vector.load %arg11[%c0_39, %c0_40] : memref<1x32xf32, #tpu.memory_space<vmem>>, vector<1x32xf32>
    %88 = vector.extract_strided_slice %82 {offsets = [0, 0], sizes = [8, 16], strides = [1, 1]} : vector<8x32xf32> to vector<8x16xf32>
    %89 = vector.extract_strided_slice %84 {offsets = [0, 0], sizes = [16, 16], strides = [1, 1]} : vector<16x64xf32> to vector<16x16xf32>
    %90 = vector.extract_strided_slice %84 {offsets = [0, 32], sizes = [16, 16], strides = [1, 1]} : vector<16x64xf32> to vector<16x16xf32>
    %cst_41 = arith.constant 0.176776692 : f32
    %91 = vector.broadcast %cst_41 : f32 to vector<8x16xf32>
    %92 = arith.mulf %88, %91 : vector<8x16xf32>
    %93 = arith.truncf %92 : vector<8x16xf32> to vector<8x16xbf16>
    %94 = arith.truncf %89 : vector<16x16xf32> to vector<16x16xbf16>
    %cst_42 = arith.constant dense<0.000000e+00> : vector<8x16xf32>
    %95 = tpu.matmul %93, %94, %cst_42 {dimension_numbers = #tpu.dot_dimension_numbers<[1], [1], [0], [0], [0, 0, 1, 0], [], []>} : vector<8x16xbf16>, vector<16x16xbf16>, vector<8x16xf32> -> vector<8x16xf32>
    %cst_43 = arith.constant dense<0xFF800000> : vector<8xf32>
    %96 = vector.multi_reduction <maximumf>, %95, %cst_43 [1] : vector<8x16xf32> to vector<8xf32>
    %97 = vector.shape_cast %96 : vector<8xf32> to vector<8x1xf32>
    %98 = vector.broadcast %97 : vector<8x1xf32> to vector<8x16xf32>
    %99 = arith.subf %95, %98 : vector<8x16xf32>
    %100 = math.exp %99 : vector<8x16xf32>
    %cst_44 = arith.constant dense<0.000000e+00> : vector<8xf32>
    %101 = vector.multi_reduction <add>, %100, %cst_44 [1] : vector<8x16xf32> to vector<8xf32>
    %102 = vector.shape_cast %101 : vector<8xf32> to vector<8x1xf32>
    %103 = tpu.reciprocal %102 {approx = true} : vector<8x1xf32> -> vector<8x1xf32>
    %104 = vector.broadcast %103 : vector<8x1xf32> to vector<8x16xf32>
    %105 = arith.mulf %100, %104 : vector<8x16xf32>
    %106 = arith.truncf %105 : vector<8x16xf32> to vector<8x16xbf16>
    %107 = arith.truncf %90 : vector<16x16xf32> to vector<16x16xbf16>
    %cst_45 = arith.constant dense<0.000000e+00> : vector<8x16xf32>
    %108 = tpu.matmul %106, %107, %cst_45 {dimension_numbers = #tpu.dot_dimension_numbers<[1], [0], [0], [1], [0, 0, 1, 1], [], []>} : vector<8x16xbf16>, vector<16x16xbf16>, vector<8x16xf32> -> vector<8x16xf32>
    %109 = vector.extract_strided_slice %82 {offsets = [0, 16], sizes = [8, 16], strides = [1, 1]} : vector<8x32xf32> to vector<8x16xf32>
    %110 = vector.extract_strided_slice %84 {offsets = [0, 16], sizes = [16, 16], strides = [1, 1]} : vector<16x64xf32> to vector<16x16xf32>
    %111 = vector.extract_strided_slice %84 {offsets = [0, 48], sizes = [16, 16], strides = [1, 1]} : vector<16x64xf32> to vector<16x16xf32>
    %cst_46 = arith.constant 0.176776692 : f32
    %112 = vector.broadcast %cst_46 : f32 to vector<8x16xf32>
    %113 = arith.mulf %109, %112 : vector<8x16xf32>
    %114 = arith.truncf %113 : vector<8x16xf32> to vector<8x16xbf16>
    %115 = arith.truncf %110 : vector<16x16xf32> to vector<16x16xbf16>
    %cst_47 = arith.constant dense<0.000000e+00> : vector<8x16xf32>
    %116 = tpu.matmul %114, %115, %cst_47 {dimension_numbers = #tpu.dot_dimension_numbers<[1], [1], [0], [0], [0, 0, 1, 0], [], []>} : vector<8x16xbf16>, vector<16x16xbf16>, vector<8x16xf32> -> vector<8x16xf32>
    %cst_48 = arith.constant dense<0xFF800000> : vector<8xf32>
    %117 = vector.multi_reduction <maximumf>, %116, %cst_48 [1] : vector<8x16xf32> to vector<8xf32>
    %118 = vector.shape_cast %117 : vector<8xf32> to vector<8x1xf32>
    %119 = vector.broadcast %118 : vector<8x1xf32> to vector<8x16xf32>
    %120 = arith.subf %116, %119 : vector<8x16xf32>
    %121 = math.exp %120 : vector<8x16xf32>
    %cst_49 = arith.constant dense<0.000000e+00> : vector<8xf32>
    %122 = vector.multi_reduction <add>, %121, %cst_49 [1] : vector<8x16xf32> to vector<8xf32>
    %123 = vector.shape_cast %122 : vector<8xf32> to vector<8x1xf32>
    %124 = tpu.reciprocal %123 {approx = true} : vector<8x1xf32> -> vector<8x1xf32>
    %125 = vector.broadcast %124 : vector<8x1xf32> to vector<8x16xf32>
    %126 = arith.mulf %121, %125 : vector<8x16xf32>
    %127 = arith.truncf %126 : vector<8x16xf32> to vector<8x16xbf16>
    %128 = arith.truncf %111 : vector<16x16xf32> to vector<16x16xbf16>
    %cst_50 = arith.constant dense<0.000000e+00> : vector<8x16xf32>
    %129 = tpu.matmul %127, %128, %cst_50 {dimension_numbers = #tpu.dot_dimension_numbers<[1], [0], [0], [1], [0, 0, 1, 1], [], []>} : vector<8x16xbf16>, vector<16x16xbf16>, vector<8x16xf32> -> vector<8x16xf32>
    %130 = tpu.concatenate %108, %129 in 1 : vector<8x16xf32>, vector<8x16xf32> -> vector<8x32xf32>
    %131 = arith.truncf %130 : vector<8x32xf32> to vector<8x32xbf16>
    %cst_51 = arith.constant dense<0.000000e+00> : vector<8x32xf32>
    %132 = tpu.matmul %131, %85, %cst_51 {dimension_numbers = #tpu.dot_dimension_numbers<[1], [0], [0], [1], [0, 0, 1, 1], [], []>} : vector<8x32xbf16>, vector<32x32xbf16>, vector<8x32xf32> -> vector<8x32xf32>
    %133 = arith.addf %132, %76 : vector<8x32xf32>
    %cst_52 = arith.constant dense<0.000000e+00> : vector<8xf32>
    %134 = vector.multi_reduction <add>, %133, %cst_52 [1] : vector<8x32xf32> to vector<8xf32>
    %135 = vector.shape_cast %134 : vector<8xf32> to vector<8x1xf32>
    %cst_53 = arith.constant 3.200000e+01 : f32
    %136 = vector.broadcast %cst_53 : f32 to vector<8x1xf32>
    %137 = arith.divf %135, %136 : vector<8x1xf32>
    %138 = vector.broadcast %137 : vector<8x1xf32> to vector<8x32xf32>
    %139 = arith.subf %133, %138 : vector<8x32xf32>
    %140 = arith.mulf %139, %139 : vector<8x32xf32>
    %cst_54 = arith.constant dense<0.000000e+00> : vector<8xf32>
    %141 = vector.multi_reduction <add>, %140, %cst_54 [1] : vector<8x32xf32> to vector<8xf32>
    %142 = vector.shape_cast %141 : vector<8xf32> to vector<8x1xf32>
    %cst_55 = arith.constant 3.100000e+01 : f32
    %143 = vector.broadcast %cst_55 : f32 to vector<8x1xf32>
    %144 = arith.divf %142, %143 : vector<8x1xf32>
    %145 = math.sqrt %144 : vector<8x1xf32>
    %cst_56 = arith.constant 9.99999971E-10 : f32
    %146 = vector.broadcast %cst_56 : f32 to vector<8x1xf32>
    %147 = arith.addf %145, %146 : vector<8x1xf32>
    %148 = tpu.reciprocal %147 {approx = true} : vector<8x1xf32> -> vector<8x1xf32>
    %149 = vector.broadcast %86 : vector<1x32xf32> to vector<8x32xf32>
    %150 = arith.mulf %149, %139 : vector<8x32xf32>
    %151 = vector.broadcast %148 : vector<8x1xf32> to vector<8x32xf32>
    %152 = arith.mulf %150, %151 : vector<8x32xf32>
    %153 = vector.broadcast %87 : vector<1x32xf32> to vector<8x32xf32>
    %154 = arith.addf %152, %153 : vector<8x32xf32>
    %155 = arith.truncf %154 : vector<8x32xf32> to vector<8x32xbf16>
    %c0_57 = arith.constant 0 : index
    %c0_58 = arith.constant 0 : index
    %156 = vector.load %arg12[%c0_57, %c0_58] : memref<32x64xbf16, #tpu.memory_space<vmem>>, vector<32x64xbf16>
    %cst_59 = arith.constant dense<0.000000e+00> : vector<8x64xf32>
    %157 = tpu.matmul %155, %156, %cst_59 {dimension_numbers = #tpu.dot_dimension_numbers<[1], [0], [0], [1], [0, 0, 1, 1], [], []>} : vector<8x32xbf16>, vector<32x64xbf16>, vector<8x64xf32> -> vector<8x64xf32>
    %cst_60 = arith.constant 0.000000e+00 : f32
    %158 = vector.broadcast %cst_60 : f32 to vector<8x64xf32>
    %159 = arith.maximumf %157, %158 : vector<8x64xf32>
    %160 = arith.truncf %159 : vector<8x64xf32> to vector<8x64xbf16>
    %c0_61 = arith.constant 0 : index
    %c0_62 = arith.constant 0 : index
    %161 = vector.load %arg13[%c0_61, %c0_62] : memref<64x32xbf16, #tpu.memory_space<vmem>>, vector<64x32xbf16>
    %cst_63 = arith.constant dense<0.000000e+00> : vector<8x32xf32>
    %162 = tpu.matmul %160, %161, %cst_63 {dimension_numbers = #tpu.dot_dimension_numbers<[1], [0], [0], [1], [0, 0, 1, 1], [], []>} : vector<8x64xbf16>, vector<64x32xbf16>, vector<8x32xf32> -> vector<8x32xf32>
    %163 = arith.addf %162, %154 : vector<8x32xf32>
    %c0_64 = arith.constant 0 : index
    %c0_65 = arith.constant 0 : index
    %164 = vector.load %arg14[%c0_64, %c0_65] : memref<1x32xf32, #tpu.memory_space<vmem>>, vector<1x32xf32>
    %c0_66 = arith.constant 0 : index
    %c0_67 = arith.constant 0 : index
    %165 = vector.load %arg15[%c0_66, %c0_67] : memref<1x32xf32, #tpu.memory_space<vmem>>, vector<1x32xf32>
    %cst_68 = arith.constant dense<0.000000e+00> : vector<8xf32>
    %166 = vector.multi_reduction <add>, %163, %cst_68 [1] : vector<8x32xf32> to vector<8xf32>
    %167 = vector.shape_cast %166 : vector<8xf32> to vector<8x1xf32>
    %cst_69 = arith.constant 3.200000e+01 : f32
    %168 = vector.broadcast %cst_69 : f32 to vector<8x1xf32>
    %169 = arith.divf %167, %168 : vector<8x1xf32>
    %170 = vector.broadcast %169 : vector<8x1xf32> to vector<8x32xf32>
    %171 = arith.subf %163, %170 : vector<8x32xf32>
    %172 = arith.mulf %171, %171 : vector<8x32xf32>
    %cst_70 = arith.constant dense<0.000000e+00> : vector<8xf32>
    %173 = vector.multi_reduction <add>, %172, %cst_70 [1] : vector<8x32xf32> to vector<8xf32>
    %174 = vector.shape_cast %173 : vector<8xf32> to vector<8x1xf32>
    %cst_71 = arith.constant 3.100000e+01 : f32
    %175 = vector.broadcast %cst_71 : f32 to vector<8x1xf32>
    %176 = arith.divf %174, %175 : vector<8x1xf32>
    %177 = math.sqrt %176 : vector<8x1xf32>
    %cst_72 = arith.constant 9.99999971E-10 : f32
    %178 = vector.broadcast %cst_72 : f32 to vector<8x1xf32>
    %179 = arith.addf %177, %178 : vector<8x1xf32>
    %180 = tpu.reciprocal %179 {approx = true} : vector<8x1xf32> -> vector<8x1xf32>
    %181 = vector.broadcast %164 : vector<1x32xf32> to vector<8x32xf32>
    %182 = arith.mulf %181, %171 : vector<8x32xf32>
    %183 = vector.broadcast %180 : vector<8x1xf32> to vector<8x32xf32>
    %184 = arith.mulf %182, %183 : vector<8x32xf32>
    %185 = vector.broadcast %165 : vector<1x32xf32> to vector<8x32xf32>
    %186 = arith.addf %184, %185 : vector<8x32xf32>
    %c0_73 = arith.constant 0 : index
    %c0_74 = arith.constant 0 : index
    %c0_75 = arith.constant 0 : index
    %187 = vector.load %arg16[%c0_73, %c0_74, %c0_75] : memref<1x8x32xf32, #tpu.memory_space<vmem>>, vector<1x8x32xf32>
    %188 = vector.shape_cast %187 : vector<1x8x32xf32> to vector<8x32xf32>
    %189 = vector.shape_cast %186 : vector<8x32xf32> to vector<1x8x32xf32>
    tpu.vector_store %arg16[%c0_73, %c0_74, %c0_75], %189 {strides = array<i32>} : memref<1x8x32xf32, #tpu.memory_space<vmem>>, vector<1x8x32xf32>,
    return
  }
  func.func @transform_0(%arg0: i32) -> (i32, i32, i32) {
    %c0_i32 = arith.constant 0 : i32
    %c0_i32_0 = arith.constant 0 : i32
    %c0_i32_1 = arith.constant 0 : i32
    return %arg0, %c0_i32, %c0_i32_0 : i32, i32, i32
  }
  func.func @transform_1(%arg0: i32) -> (i32, i32, i32) {
    %c0_i32 = arith.constant 0 : i32
    %c0_i32_0 = arith.constant 0 : i32
    %c0_i32_1 = arith.constant 0 : i32
    return %arg0, %c0_i32, %c0_i32_0 : i32, i32, i32
  }
  func.func @transform_2(%arg0: i32) -> (i32, i32) {
    %c0_i32 = arith.constant 0 : i32
    %c0_i32_0 = arith.constant 0 : i32
    %c0_i32_1 = arith.constant 0 : i32
    return %c0_i32, %c0_i32_0 : i32, i32
  }
  func.func @transform_3(%arg0: i32) -> (i32, i32) {
    %c0_i32 = arith.constant 0 : i32
    %c0_i32_0 = arith.constant 0 : i32
    %c0_i32_1 = arith.constant 0 : i32
    return %c0_i32, %c0_i32_0 : i32, i32
  }
  func.func @transform_4(%arg0: i32) -> (i32, i32) {
    %c0_i32 = arith.constant 0 : i32
    %c0_i32_0 = arith.constant 0 : i32
    %c0_i32_1 = arith.constant 0 : i32
    return %c0_i32, %c0_i32_0 : i32, i32
  }
  func.func @transform_5(%arg0: i32) -> (i32, i32) {
    %c0_i32 = arith.constant 0 : i32
    %c0_i32_0 = arith.constant 0 : i32
    %c0_i32_1 = arith.constant 0 : i32
    return %c0_i32, %c0_i32_0 : i32, i32
  }
  func.func @transform_6(%arg0: i32) -> (i32, i32) {
    %c0_i32 = arith.constant 0 : i32
    %c0_i32_0 = arith.constant 0 : i32
    %c0_i32_1 = arith.constant 0 : i32
    return %c0_i32, %c0_i32_0 : i32, i32
  }
  func.func @transform_7(%arg0: i32) -> (i32, i32) {
    %c0_i32 = arith.constant 0 : i32
    %c0_i32_0 = arith.constant 0 : i32
    %c0_i32_1 = arith.constant 0 : i32
    return %c0_i32, %c0_i32_0 : i32, i32
  }
  func.func @transform_8(%arg0: i32) -> (i32, i32) {
    %c0_i32 = arith.constant 0 : i32
    %c0_i32_0 = arith.constant 0 : i32
    %c0_i32_1 = arith.constant 0 : i32
    return %c0_i32, %c0_i32_0 : i32, i32
  }
  func.func @transform_9(%arg0: i32) -> (i32, i32) {
    %c0_i32 = arith.constant 0 : i32
    %c0_i32_0 = arith.constant 0 : i32
    %c0_i32_1 = arith.constant 0 : i32
    return %c0_i32, %c0_i32_0 : i32, i32
  }
  func.func @transform_10(%arg0: i32) -> (i32, i32) {
    %c0_i32 = arith.constant 0 : i32
    %c0_i32_0 = arith.constant 0 : i32
    %c0_i32_1 = arith.constant 0 : i32
    return %c0_i32, %c0_i32_0 : i32, i32
  }
  func.func @transform_11(%arg0: i32) -> (i32, i32) {
    %c0_i32 = arith.constant 0 : i32
    %c0_i32_0 = arith.constant 0 : i32
    %c0_i32_1 = arith.constant 0 : i32
    return %c0_i32, %c0_i32_0 : i32, i32
  }
  func.func @transform_12(%arg0: i32) -> (i32, i32) {
    %c0_i32 = arith.constant 0 : i32
    %c0_i32_0 = arith.constant 0 : i32
    %c0_i32_1 = arith.constant 0 : i32
    return %c0_i32, %c0_i32_0 : i32, i32
  }
  func.func @transform_13(%arg0: i32) -> (i32, i32) {
    %c0_i32 = arith.constant 0 : i32
    %c0_i32_0 = arith.constant 0 : i32
    %c0_i32_1 = arith.constant 0 : i32
    return %c0_i32, %c0_i32_0 : i32, i32
  }
  func.func @transform_14(%arg0: i32) -> (i32, i32) {
    %c0_i32 = arith.constant 0 : i32
    %c0_i32_0 = arith.constant 0 : i32
    %c0_i32_1 = arith.constant 0 : i32
    return %c0_i32, %c0_i32_0 : i32, i32
  }
  func.func @transform_15(%arg0: i32) -> (i32, i32, i32) {
    %c0_i32 = arith.constant 0 : i32
    %c0_i32_0 = arith.constant 0 : i32
    %c0_i32_1 = arith.constant 0 : i32
    return %arg0, %c0_i32, %c0_i32_0 : i32, i32, i32
  }
}

</mosaic_0001>

<bundles_post_ra>
// kernel: tpu_custom_call.1
= control target key start
LH: loop header
LB: loop body
LE: loop exit
PB: predicated region body
PF: predicated region fallthrough
CT: control target
= control target key end

     0   :  { %s2910_s0 = inlined_call_operand.vmem [shape: f32[2,8,32], index: 0, kind: input, shape index: {}]   ;;  %s2911_s1 = inlined_call_operand.vmem [shape: f32[2,16,32], index: 1, kind: input, shape index: {}]   ;;  %s2912_s2 = inlined_call_operand.hbm [shape: bf16[32,96], index: 2, kind: input, shape index: {}]   ;;  %s2913_s3 = inlined_call_operand.hbm [shape: bf16[32,32], index: 3, kind: input, shape index: {}]   ;;  %s2914_s4 = inlined_call_operand.hbm [shape: f32[1,32], index: 4, kind: input, shape index: {}]   ;;  %s2915_s5 = inlined_call_operand.hbm [shape: f32[1,32], index: 5, kind: input, shape index: {}]   ;;  %s2916_s6 = inlined_call_operand.hbm [shape: bf16[32,32], index: 6, kind: input, shape index: {}]   ;;  %s2917_s7 = inlined_call_operand.hbm [shape: bf16[32,64], index: 7, kind: input, shape index: {}]   ;;  %s2918_s8 = inlined_call_operand.hbm [shape: bf16[32,32], index: 8, kind: input, shape index: {}]   ;;  %s2919_s9 = inlined_call_operand.hbm [shape: f32[1,32], index: 9, kind: input, shape index: {}]   ;;  %s2920_s10 = inlined_call_operand.vmem [shape: f32[1,32], index: 10, kind: input, shape index: {}]   ;;  %s2921_s11 = inlined_call_operand.vmem [shape: bf16[32,64], index: 11, kind: input, shape index: {}]   ;;  %s2922_s12 = inlined_call_operand.vmem [shape: bf16[64,32], index: 12, kind: input, shape index: {}]   ;;  %s2923_s13 = inlined_call_operand.vmem [shape: f32[1,32], index: 13, kind: input, shape index: {}]   ;;  %s2924_s14 = inlined_call_operand.vmem [shape: f32[1,32], index: 14, kind: input, shape index: {}]   ;;  %s2925_s15 = inlined_call_operand.hbm [shape: f32[2,8,32], index: 15, kind: output, shape index: {}]  }
   0x1   :  { %2938 = sst [smem:[#allocation29_spill]] %s2924_s14 }
   0x2   :  { %2939 = sst [smem:[#allocation30_spill]] %s2925_s15 }
   0x3   :  { %20 = vsyncpa [#allocation3], 0 }
   0x4   :  { %21 = vsyncpa [#allocation6], 0 }
   0x5   :  { %22 = vsyncpa [#allocation9], 0 }
   0x6   :  { %23 = vsyncpa [#allocation12], 0 }
   0x7   :  { %24 = vsyncpa [#allocation15], 0 }
   0x8   :  { %25 = vsyncpa [#allocation4], 0 }
   0x9   :  { %27 = vsyncpa [#allocation4 + $0x1], 0  ;;  %s2569_s18 = smov 0   ;;  %s2571_s19 = smov 0  }
   0xa   :  { %s2573_s20 = smov 0   ;;  %s2575_s21 = smov 0  }
   0xb LB: > { %2940 = sst [smem:[#allocation23_spill]] %s2456_s18  ;;  %s2590_s22 = sadd.s32 4294967295, %s2468_s21   ;;  %s2468_s21 = sphi %s2575_s21, %s2970_s21   ;;  %s2464_s20 = sphi %s2573_s20, %s2972_s20   ;;  %s2460_s19 = sphi %s2571_s19, %s2974_s19   ;;  %s2456_s18 = sphi %s2569_s18, %s2973_s18  }
   0xc   : > { %2941 = sst [smem:[#allocation24_spill]] %s2464_s20  ;;  %s1793_s23 = sadd.s32 4294967294, %s2468_s21  }
   0xd   : > { %2942 = sst [smem:[#allocation25_spill]] %s2468_s21  ;;  %s2594_s24 = sadd.s32 1, %s2468_s21  }
   0xe   : > { %2943 = sst [smem:[#allocation26_spill]] %s2594_s24  ;;  %s365_s25 = sadd.s32 1, %s2464_s20 }
   0xf   : > { %s362_s26 = ssub.s32 %s2468_s21, %s2594_s24  ;;  %p375_p0 = scmp.ne.s32.totalorder %s2464_s20, %s2460_s19 }
  0x10   : > { %p363_p1 = scmp.eq.s32.totalorder %s362_s26, 0  ;;  %p376_p2 = scmp.eq.s32.totalorder %s2590_s22, 1 }
  0x11   : > { %p381_p3 = scmp.ne.s32.totalorder %s2460_s19, %s2456_s18  ;;  %p382_p4 = scmp.eq.s32.totalorder %s1793_s23, 1 }
  0x12   : > { %s2605_s27 = scalar_select %p363_p1, %s2464_s20, %s365_s25  }
  0x13   : > { %p2607_p5 = por %p376_p2, %p375_p0  ;;  %p2611_p6 = por %p382_p4, %p381_p3 }
  0x14   : > { %2944 = sst [smem:[#allocation27_spill]] %s2605_s27  ;;  %p1794_p7 = scmp.ge.s32.totalorder %s2468_s21, 1 }
  0x15   : > { %s2945_s28 = scalar_select %p2607_p5, 1, 0 }
  0x16   : > { %s2946_s29 = scalar_select %p2611_p6, 1, 0 }
  0x17   : > { %p389_p8 = scmp.lt.s32.totalorder %s2468_s21, 3  ;;  %p2933_p9 = scmp.eq.s32.totalorder %s2590_s22, 0 }
  0x18   : > { %2947 = sst [smem:[#allocation28_spill]] %s2946_s29  ;;  %s2470_s16 = smov [#allocation5]  }
  0x19   : > { %p2618_p10 = pnand %p1794_p7, %p389_p8  ;;  %s414_s17 = sshll.u32 %s2470_s16, 4  ;;  %s415_s17 = int_to_ptr.vmem [resolvable:$true] %s414_s17 }
  0x1a   : > { %s2471_s25 = smov [#allocation8]   ;;  %s2472_s27 = smov [#allocation11]  }
  0x1b   : > { %s2948_s30 = scalar_select %p2618_p10, 1, 0 }
  0x1c   : > { %p2040_p11 = pneg %p2618_p10  ;;  %s439_s26 = sshll.u32 %s2471_s25, 4  ;;  %s440_s26 = int_to_ptr.vmem [resolvable:$true] %s439_s26 }
  0x1d   : > { %s462_s20 = sshll.u32 %s2472_s27, 4  ;;  %s2191_s29 = scalar_lea.vmem %s415_s17, 256  ;;  %s463_s20 = int_to_ptr.vmem [resolvable:$true] %s462_s20 }
  0x1e   : > { %p2626_p12 = pnand %p2933_p9, %p2040_p11  ;;  %p2192_p0 = scmp.ne.s32.totalorder %s415_s17, %s2191_s29 }
  0x1f   : > { %p2199_p3 = scmp.lt.s32.totalorder %s415_s17, %s415_s17  ;;  %p2200_p4 = scmp.lt.s32.totalorder %s2191_s29, %s2191_s29 }
  0x20   : > { %p2632_p13 = pneg %p2626_p12 }
  0x21   : > { %p2201_p7 = por %p2200_p4, %p2199_p3 }
  0x22   : > { %p2194_p1 = pnand %p2192_p0, %p2632_p13 }
  0x24   : > { %p2195_p2 = pneg %p2194_p1 }
  0x26   : > { %p2202_p8 = pnand %p2201_p7, %p2195_p2 }
  0x28   : > { %2205 = shalt.err (!%p2202_p8)
}
  0x29   : > { %s2936_s16 = smov 64   ;;  %s2474_s27 = smov 4  }
  0x2a   : > { %2046 = dma.hbm_to_vmem [thread:$0]  (!%p2626_p12), %s2913_s3, 256, %s415_s17, [#allocation6], %s2936_s16, %s2936_s16, %s2474_s27  }
  0x2b   : > { %s2217_s21 = scalar_lea.vmem %s440_s26, 16  ;;  %s2224_s29 = scalar_lea.vmem %s440_s26, 32 }
  0x2c   : > { %p2218_p11 = scmp.ne.s32.totalorder %s440_s26, %s2217_s21  ;;  %p2225_p2 = scmp.lt.s32.totalorder %s440_s26, %s440_s26 }
  0x2d   : > { %p2226_p3 = scmp.lt.s32.totalorder %s2224_s29, %s2217_s21 }
  0x2e   : > { %p2220_p0 = pnand %p2218_p11, %p2632_p13 }
  0x2f   : > { %p2227_p4 = por %p2226_p3, %p2225_p2 }
  0x30   : > { %p2221_p1 = pneg %p2220_p0 }
  0x32   : > { %p2228_p7 = pnand %p2227_p4, %p2221_p1 }
  0x34   : > { %2231 = shalt.err (!%p2228_p7)
}
  0x35   : > { %2052 = dma.hbm_to_vmem [thread:$0]  (!%p2626_p12), %s2915_s5, 16, %s440_s26, [#allocation9]  }
  0x36   : > { %s2243_s18 = scalar_lea.vmem %s463_s20, 256  ;;  %p2251_p0 = scmp.lt.s32.totalorder %s463_s20, %s463_s20 }
  0x37   : > { %p2244_p8 = scmp.ne.s32.totalorder %s463_s20, %s2243_s18  ;;  %p2252_p6 = scmp.lt.s32.totalorder %s2243_s18, %s2243_s18 }
  0x39   : > { %p2246_p9 = pnand %p2244_p8, %p2632_p13  ;;  %p2253_p5 = por %p2252_p6, %p2251_p0 }
  0x3b   : > { %p2247_p11 = pneg %p2246_p9 }
  0x3d   : > { %p2254_p10 = pnand %p2253_p5, %p2247_p11 }
  0x3f   : > { %2257 = shalt.err (!%p2254_p10)
}
  0x40   : > { %2058 = dma.hbm_to_vmem [thread:$0]  (!%p2626_p12), %s2917_s7, 256, %s463_s20, [#allocation12], %s2936_s16, %s2936_s16, %s2474_s27  }
  0x41   : > { %s2475_s15 = smov [#allocation2]   ;;  %s2476_s26 = smov [#allocation7]  }
  0x42   : > { %s401_s17 = sshll.u32 %s2475_s15, 4  ;;  %s428_s25 = sshll.u32 %s2476_s26, 4  ;;  %s402_s17 = int_to_ptr.vmem [resolvable:$true] %s401_s17  ;;  %s429_s25 = int_to_ptr.vmem [resolvable:$true] %s428_s25 }
  0x43   : > { %s2269_s29 = scalar_lea.vmem %s402_s17, 256  ;;  %p2277_p10 = scmp.lt.s32.totalorder %s402_s17, %s402_s17 }
  0x44   : > { %p2270_p9 = scmp.ne.s32.totalorder %s402_s17, %s2269_s29  ;;  %p2278_p1 = scmp.lt.s32.totalorder %s2269_s29, %s2269_s29 }
  0x46   : > { %p2272_p5 = pnand %p2270_p9, %p2632_p13  ;;  %p2279_p2 = por %p2278_p1, %p2277_p10 }
  0x48   : > { %p2273_p6 = pneg %p2272_p5 }
  0x4a   : > { %p2280_p3 = pnand %p2279_p2, %p2273_p6 }
  0x4c   : > { %2283 = shalt.err (!%p2280_p3)
}
  0x4d   : > { %2043 = dma.hbm_to_vmem [thread:$0]  (!%p2626_p12), %s2912_s2, 256, %s402_s17, [#allocation3], %s2936_s16, %s2936_s16, %s2474_s27  }
  0x4e   : > { %s2295_s21 = scalar_lea.vmem %s429_s25, 16  ;;  %s2302_s14 = scalar_lea.vmem %s429_s25, 32 }
  0x4f   : > { %p2296_p4 = scmp.ne.s32.totalorder %s429_s25, %s2295_s21  ;;  %p2303_p11 = scmp.lt.s32.totalorder %s429_s25, %s429_s25 }
  0x50   : > { %p2304_p0 = scmp.lt.s32.totalorder %s2302_s14, %s2295_s21 }
  0x51   : > { %p2298_p7 = pnand %p2296_p4, %p2632_p13 }
  0x52   : > { %p2305_p9 = por %p2304_p0, %p2303_p11 }
  0x53   : > { %p2299_p8 = pneg %p2298_p7 }
  0x55   : > { %p2306_p5 = pnand %p2305_p9, %p2299_p8 }
  0x57   : > { %2309 = shalt.err (!%p2306_p5)
}
  0x58   : > { %2049 = dma.hbm_to_vmem [thread:$0]  (!%p2626_p12), %s2914_s4, 16, %s429_s25, [#allocation6]  }
  0x59   : > { %s2477_s17 = smov [#allocation10]   ;;  %s2478_s20 = smov [#allocation13]  }
  0x5a   : > { %s449_s29 = sshll.u32 %s2477_s17, 4  ;;  %s475_s18 = sshll.u32 %s2478_s20, 4  ;;  %s450_s29 = int_to_ptr.vmem [resolvable:$true] %s449_s29  ;;  %s476_s18 = int_to_ptr.vmem [resolvable:$true] %s475_s18 }
  0x5b   : > { %s2321_s16 = scalar_lea.vmem %s450_s29, 256  ;;  %p2329_p2 = scmp.lt.s32.totalorder %s450_s29, %s450_s29 }
  0x5c   : > { %p2322_p6 = scmp.ne.s32.totalorder %s450_s29, %s2321_s16  ;;  %p2330_p3 = scmp.lt.s32.totalorder %s2321_s16, %s2321_s16 }
  0x5e   : > { %p2324_p10 = pnand %p2322_p6, %p2632_p13  ;;  %p2331_p4 = por %p2330_p3, %p2329_p2 }
  0x60   : > { %p2325_p1 = pneg %p2324_p10 }
  0x62   : > { %p2332_p7 = pnand %p2331_p4, %p2325_p1 }
  0x64   : > { %2335 = shalt.err (!%p2332_p7)
}
  0x65   : > { %s2951_s21 = smov 64   ;;  %s2347_s15 = scalar_lea.vmem %s476_s18, 256 }
  0x66   : > { %2055 = dma.hbm_to_vmem [thread:$0]  (!%p2626_p12), %s2916_s6, 256, %s450_s29, [#allocation9], %s2951_s21, %s2951_s21, %s2474_s27  }
  0x67   : > { %p2348_p8 = scmp.ne.s32.totalorder %s476_s18, %s2347_s15  ;;  %p2355_p9 = scmp.lt.s32.totalorder %s476_s18, %s476_s18 }
  0x68   : > { %p2356_p5 = scmp.lt.s32.totalorder %s2347_s15, %s2347_s15 }
  0x69   : > { %p2350_p11 = pnand %p2348_p8, %p2632_p13 }
  0x6a   : > { %p2357_p6 = por %p2356_p5, %p2355_p9 }
  0x6b   : > { %p2351_p0 = pneg %p2350_p11 }
  0x6d   : > { %p2358_p10 = pnand %p2357_p6, %p2351_p0 }
  0x6f   : > { %2361 = shalt.err (!%p2358_p10)
}
  0x70   : > { %2061 = dma.hbm_to_vmem [thread:$0]  (!%p2626_p12), %s2918_s8, 256, %s476_s18, [#allocation12], %s2951_s21, %s2951_s21, %s2474_s27  }
  0x71   : > { %s2479_s17 = smov [#allocation14]  }
  0x72   : > { %s489_s29 = sshll.u32 %s2479_s17, 4  ;;  %s490_s29 = int_to_ptr.vmem [resolvable:$true] %s489_s29 }
  0x73   : > { %s2373_s20 = scalar_lea.vmem %s490_s29, 16  ;;  %s2380_s25 = scalar_lea.vmem %s490_s29, 32 }
  0x74   : > { %p2374_p1 = scmp.ne.s32.totalorder %s490_s29, %s2373_s20  ;;  %p2381_p4 = scmp.lt.s32.totalorder %s490_s29, %s490_s29 }
  0x75   : > { %p2382_p7 = scmp.lt.s32.totalorder %s2380_s25, %s2373_s20 }
  0x76   : > { %p2376_p2 = pnand %p2374_p1, %p2632_p13 }
  0x77   : > { %p2383_p8 = por %p2382_p7, %p2381_p4 }
  0x78   : > { %p2377_p3 = pneg %p2376_p2 }
  0x7a   : > { %p2384_p11 = pnand %p2383_p8, %p2377_p3 }
  0x7c   : > { %2387 = shalt.err (!%p2384_p11)
}
  0x7d   : > { %2064 = dma.hbm_to_vmem [thread:$0]  (!%p2626_p12), %s2919_s9, 16, %s490_s29, [#allocation15]  }
  0x7e   : > { %p2952_p0 = scmp.ne.s32.totalorder %s2948_s30, 0 }
  0x7f   : > { %p2953_p9 = scmp.eq.s32.totalorder (!%p2952_p0), %s2590_s22, 0 }
  0x80   : > { %532 = sbr.rel (%p2952_p0) target bundleno = 4201 (0x1069), region = 80 }
  0x85   : > { %2431 = dma.done.wait (%p2953_p9), [#allocation3], 256   ;;  %p2954_p13 = pmov %p2953_p9 }
  0x86   : > { %p2955_p5 = pmov %p2953_p9 }
  0x87   : > { %2433 = vsyncadd (%p2954_p13), [#allocation3], 4294967040 }
  0x88   : > { %2435 = dma.done.wait (%p2955_p5), [#allocation6], 272   ;;  %p2956_p6 = pmov %p2955_p5 }
  0x89   : > { %p2957_p10 = pmov %p2955_p5 }
  0x8a   : > { %2437 = vsyncadd (%p2956_p6), [#allocation6], 4294967024 }
  0x8b   : > { %2439 = dma.done.wait (%p2957_p10), [#allocation9], 272   ;;  %p2958_p12 = pmov %p2955_p5 }
  0x8c   : > { %p2959_p1 = pmov %p2955_p5 }
  0x8d   : > { %2441 = vsyncadd (%p2958_p12), [#allocation9], 4294967024 }
  0x8e   : > { %2443 = dma.done.wait (%p2959_p1), [#allocation12], 512   ;;  %p2960_p2 = pmov %p2959_p1 }
  0x8f   : > { %p2961_p3 = pmov %p2959_p1 }
  0x90   : > { %2445 = vsyncadd (%p2960_p2), [#allocation12], 4294966784 }
  0x91   : > { %2447 = dma.done.wait (%p2961_p3), [#allocation15], 16   ;;  %p2962_p4 = pmov %p2959_p1 }
  0x92   : > { %p612_p7 = scmp.lt.s32.totalorder %s2590_s22, 1  ;;  %v2480_v0 = vmov 0.0   ;;  %vm2481_vm0 = vmmov 0   ;;  %v2136_v1 = vld [vmem:[#allocation2 + $0x8] sm:$0xff]   ;;  %v2137_v2 = vld [vmem:[#allocation2] sm:$0xff]   ;;  %vm640_vm1 = vcmask 261120  }
  0x93   : > { %2449 = vsyncadd (%p2962_p4), [#allocation15], 4294967280  ;;  %1898 = vmatprep.subr.bf16.mxu1 %v2480_v0  ;;  %1902 = vmatprep.mubr.msk.bf16.mxu1 %vm2481_vm0, %v2480_v0  ;;  %s2482_s21 = smov 96   ;;  %s2483_s16 = smov 112   ;;  %vm696_vm2 = vcmask 130048   ;;  %vm743_vm3 = vcmask 64512  }
  0x94   : > { %s2734_s24 = scalar_select %p612_p7, %s2590_s22, 1  ;;  %1912 = vmatprep.subr.bf16.mxu0 %v2480_v0  ;;  %1914 = vmatprep.mubr.msk.bf16.mxu0 %vm2481_vm0, %v2480_v0  ;;  %vm761_vm4 = vcmask 1043456   ;;  %v2138_v49 = vld [vmem:[#allocation5 + $0x8] sm:$0xff]   ;;  %v2139_v50 = vld [vmem:[#allocation5] sm:$0xff]   ;;  %vm1548_vm9 = vcmask 523264  }
  0x95   : > { %1899 = vmatpush3.bf16.msra.mxu1 %v2136_v1  ;;  %s2484_s26 = smov 80   ;;  %s2485_s17 = smov 64  }
  0x96   : > { %s1814_s30 = sshll.u32 %s2734_s24, 3  ;;  %1900 = vmatprep.subr.bf16.mxu1 %v2480_v0  ;;  %s2486_s29 = smov 48  }
  0x97   : > { %s615_s18 = scalar_lea.vmem %s2910_s0, %s1814_s30  ;;  %s2487_s20 = smov 16  }
  0x98   : > { %v2743_v3 = vld [vmem:[%s615_s18] sm:$0xff]  ;;  %s1858_s25 = sshll.u32 %s2734_s24, 4  ;;  %s609_s24 = sand.u32 1, %s2460_s19  }
  0x99   : > { %v623_v4 = vpack.c.bf16 %v2743_v3, %v2743_v3  ;;  %1901 = vmatpush3.bf16.msra.mxu1 %v2137_v2  ;;  %s620_s30 = scalar_lea.vmem %s2911_s1, %s1858_s25  ;;  %s1813_s23 = sshll.u32 %s609_s24, 3 }
  0x9a   : > { %1906 = vmatprep.subr.bf16.mxu1 %v2480_v0  ;;  %s2964_s15 = sld [smem:[#allocation30_spill]]  ;;  %s1630_s27 = scalar_lea.sflag [#allocation4], %s609_s24 }
  0x9b   : > { %p2965_p11 = scmp.ne.s32.totalorder %s2945_s28, 0 }
  0x9c   : > { %1903 = vmatmul.mubr.msk.bf16.vlgmr.msra.gmra.mxu1 %vm640_vm1, %v623_v4 }
  0x9d   : > { %1908 = vmatprep.mubr.msk.bf16.mxu1 %vm2481_vm0, %v2480_v0 }
 0x15c   : > { %v678_v5 = vpop.f32.mrf.mxu1 }
 0x15d   : > { %v690_v6 = vmul.f32 0.17677669, %v678_v5  ;;  %v692_v7 = vpack.c.bf16 %v678_v5, %v678_v5 }
 0x15e   : > { %v1904_v8 = vpop.f32.mrf.mxu1 }
 0x15f   : > { %694 = vrot.lane.b32.xlu0 %v692_v7, %s2482_s21  ;;  %v691_v9 = vpack.c.bf16 %v690_v6, %v690_v6 }
 0x160   : > { %v681_v10 = vpop.f32.mrf.mxu1 }
 0x161   : > { %806 = vrot.lane.b32.xlu1 %v691_v9, %s2483_s16 }
 0x162   : > { %v1905_v11 = vpop.f32.mrf.mxu1 }
 0x163   : > { %808 = vrot.lane.b32.xlu0 %v692_v7, %s2484_s26  ;;  %v2140_v11 = vld [vmem:[#allocation11 + $0x8] sm:$0xff]  }
 0x1d1   : > { %v695_v12 = vpop.permute.xlu0 %694 }
 0x1d2   : > { %v701_v13 = vsel %vm696_vm2, %v695_v12, 0  ;;  %v2141_v12 = vld [vmem:[#allocation11] sm:$0xff]  }
 0x1d3   : > { %1907 = vmatpush3.bf16.xpose.msra.mxu1 %v701_v13  ;;  %v807_v16 = vpop.permute.xlu1 %806  ;;  %v1013_v13 = vld [vmem:[%s620_s30] sm:$0xff] }
 0x1d4   : > { %1918 = vmatprep.subr.bf16.mxu1 %v2480_v0 }
 0x1d5   : > { %v809_v14 = vpop.permute.xlu0 %808 }
 0x1d6   : > { %v814_v15 = vsel %vm696_vm2, %v809_v14, 0  ;;  %v1014_v14 = vld [vmem:[%s620_s30 + $0x8] sm:$0xff] }
 0x1da   : > { %1909 = vmatmul.mubr.msk.bf16.vlgmr.msra.gmra.mxu1 %vm696_vm2, %v691_v9 }
 0x1db   : > { %1919 = vmatpush3.bf16.xpose.msra.mxu1 %v814_v15  ;;  %1920 = vmatprep.mubr.msk.bf16.mxu1 %vm2481_vm0, %v2480_v0  ;;  %v1015_v15 = vpack.c.bf16 %v1014_v14, %v1013_v13  ;;  %v2144_v14 = vld [vmem:[#allocation13 + $0x8] sm:$0xff]  }
 0x1dc   : > { %1930 = vmatprep.subr.bf16.mxu1 %v2480_v0 }
 0x1e2   : > { %1921 = vmatmul.mubr.msk.bf16.vlgmr.msra.gmra.mxu1 %vm696_vm2, %v807_v16  ;;  %v2143_v16 = vld [vmem:[#allocation10] sm:$0xff]  }
 0x1e3   : > { %1934 = vmatprep.mubr.msk.bf16.mxu1 %vm2481_vm0, %v2480_v0  ;;  %1931 = vmatpush3.bf16.msra.mxu1 %v2138_v49 }
 0x1e4   : > { %1932 = vmatprep.subr.bf16.mxu1 %v2480_v0 }
 0x1e7   : > { %1933 = vmatpush3.bf16.msra.mxu1 %v2139_v50 }
 0x1e8   : > { %1946 = vmatprep.subr.bf16.mxu1 %v2480_v0 }
 0x29a   : > { %v737_v17 = vpop.f32.mrf.mxu1 }
 0x29b   : > { %v744_v18 = vsel %vm743_vm3, %v737_v17, -inf }
 0x29c   : > { %745 = vmax.xlane.f32.xlu1 %v744_v18  ;;  %v1910_v19 = vpop.f32.mrf.mxu1 }
 0x29e   : > { %v740_v20 = vpop.f32.mrf.mxu1 }
 0x2a0   : > { %v1911_v21 = vpop.f32.mrf.mxu1 }
 0x2a2   : > { %v850_v22 = vpop.f32.mrf.mxu1 }
 0x2a3   : > { %v856_v23 = vsel %vm743_vm3, %v850_v22, -inf }
 0x2a4   : > { %857 = vmax.xlane.f32.xlu0 %v856_v23  ;;  %v1922_v24 = vpop.f32.mrf.mxu1 }
 0x2a6   : > { %v853_v25 = vpop.f32.mrf.mxu1 }
 0x2a7   : > { %v1827_v25 = vld [vmem:[#allocation7] ss:$0 sm:$0xff] }
 0x2a8   : > { %v1923_v26 = vpop.f32.mrf.mxu1 }
 0x325   : > { %v746_v27 = vpop.xlane.xlu1 %745 }
 0x326   : > { %v747_v28 = vsub.f32 %v737_v17, %v746_v27 }
 0x328   : > { %v748_v29 = vmul.f32 1.442695, %v747_v28  ;;  %v1828_v28 = vld [vmem:[#allocation8] ss:$0 sm:$0xff] }
 0x32a   : > { %2152 = vpow2.f32 %v748_v29 }
 0x32d   : > { %v858_v30 = vpop.xlane.xlu0 %857 }
 0x32e   : > { %v859_v31 = vsub.f32 %v850_v22, %v858_v30 }
 0x330   : > { %v860_v32 = vmul.f32 1.442695, %v859_v31 }
 0x332   : > { %2154 = vpow2.f32 %v860_v32 }
 0x337   : > { %v2153_v33 = vpop.eup %2152 }
 0x338   : > { %v750_v34 = vsel %vm743_vm3, %v2153_v33, 0.0 }
 0x339   : > { %751 = vadd.xlane.f32.xlu0 %v750_v34 }
 0x33f   : > { %v2155_v35 = vpop.eup %2154 }
 0x340   : > { %v862_v36 = vsel %vm743_vm3, %v2155_v35, 0.0 }
 0x341   : > { %863 = vadd.xlane.f32.xlu1 %v862_v36 }
 0x34f   : > { %756 = vrot.lane.b32.xlu0 %v692_v7, %s2485_s17  ;;  %s1855_s17 = sshll.u32 %s2590_s22, 7 }
 0x350   : > { %s1641_s30 = scalar_lea.hbm %s2964_s15, %s1855_s17 }
 0x352   : > { %868 = vrot.lane.b32.xlu1 %v692_v7, %s2486_s29  ;;  %s611_s29 = scalar_lea.vmem [#allocation16], %s1813_s23 }
 0x3c2   : > { %v752_v37 = vpop.xlane.xlu0 %751 }
 0x3c3   : > { %2156 = vrcp.f32 %v752_v37 }
 0x3c6   : > { %v757_v38 = vpop.permute.xlu0 %756 }
 0x3c7   : > { %v763_v39 = vsel %vm761_vm4, %v757_v38, 0 }
 0x3c8   : > { %1913 = vmatpush3.bf16.msra.mxu0 %v763_v39 }
 0x3c9   : > { %1924 = vmatprep.subr.bf16.mxu0 %v2480_v0 }
 0x3ca   : > { %v864_v40 = vpop.xlane.xlu1 %863 }
 0x3cb   : > { %2158 = vrcp.f32 %v864_v40 }
 0x3ce   : > { %v869_v43 = vpop.permute.xlu1 %868 }
 0x3cf   : > { %v874_v45 = vsel %vm761_vm4, %v869_v43, 0 }
 0x3d0   : > { %v2157_v41 = vpop.eup %2156 }
 0x3d1   : > { %v754_v42 = vmul.f32 %v2157_v41, %v2153_v33 }
 0x3d3   : > { %v755_v44 = vpack.c.bf16 %v754_v42, %v754_v42 }
 0x3d5   : > { %1915 = vmatmul.mubr.msk.bf16.vlgmr.msra.gmra.mxu0 %vm743_vm3, %v755_v44 }
 0x3d6   : > { %1925 = vmatpush3.bf16.msra.mxu0 %v874_v45  ;;  %1926 = vmatprep.mubr.msk.bf16.mxu0 %vm2481_vm0, %v2480_v0 }
 0x3d7   : > { %1938 = vmatprep.subr.bf16.mxu0 %v2480_v0 }
 0x3d8   : > { %v2159_v46 = vpop.eup %2158 }
 0x3d9   : > { %v866_v47 = vmul.f32 %v2159_v46, %v2155_v35 }
 0x3db   : > { %v867_v48 = vpack.c.bf16 %v866_v47, %v866_v47 }
 0x3dd   : > { %1927 = vmatmul.mubr.msk.bf16.vlgmr.msra.gmra.mxu0 %vm743_vm3, %v867_v48 }
 0x3de   : > { %1942 = vmatprep.mubr.msk.bf16.mxu0 %vm2481_vm0, %v2480_v0 }
 0x495   : > { %v799_v51 = vpop.f32.mrf.mxu0 }
 0x497   : > { %v1916_v52 = vpop.f32.mrf.mxu0 }
 0x499   : > { %v802_v53 = vpop.f32.mrf.mxu0 }
 0x49b   : > { %v1917_v54 = vpop.f32.mrf.mxu0 }
 0x49d   : > { %v910_v55 = vpop.f32.mrf.mxu0 }
 0x49e   : > { %917 = vrot.lane.b32.xlu1 %v910_v55, %s2487_s20 }
 0x49f   : > { %v1928_v56 = vpop.f32.mrf.mxu0 }
 0x4a1   : > { %v913_v57 = vpop.f32.mrf.mxu0 }
 0x4a3   : > { %v1929_v58 = vpop.f32.mrf.mxu0 }
 0x510   : > { %v918_v59 = vpop.permute.xlu1 %917 }
 0x511   : > { %v920_v60 = vsel %vm696_vm2, %v799_v51, %v918_v59 }
 0x512   : > { %v921_v61 = vpack.c.bf16 %v920_v60, %v920_v60 }
 0x514   : > { %1935 = vmatmul.mubr.msk.bf16.vlgmr.msra.gmra.mxu1 %vm640_vm1, %v921_v61 }
 0x515   : > { %1950 = vmatprep.mubr.msk.bf16.mxu1 %vm2481_vm0, %v2480_v0  ;;  %1947 = vmatpush3.bf16.msra.mxu1 %v2140_v11 }
 0x516   : > { %1948 = vmatprep.subr.bf16.mxu1 %v2480_v0 }
 0x519   : > { %1949 = vmatpush3.bf16.msra.mxu1 %v2141_v12 }
 0x51a   : > { %1960 = vmatprep.subr.bf16.mxu1 %v2480_v0 }
 0x51c   : > { %1951 = vmatmul.mubr.msk.bf16.vlgmr.msra.gmra.mxu1 %vm640_vm1, %v1015_v15 }
 0x51d   : > { %1962 = vmatprep.mubr.msk.bf16.mxu1 %vm2481_vm0, %v2480_v0 }
 0x5d4   : > { %v971_v62 = vpop.f32.mrf.mxu1 }
 0x5d5   : > { %v972_v63 = vadd.f32 %v971_v62, %v2743_v3  ;;  %v2142_v3 = vld [vmem:[#allocation10 + $0x8] sm:$0xff]  }
 0x5d6   : > { %v1936_v1 = vpop.f32.mrf.mxu1  ;;  %1939 = vmatpush3.bf16.msra.mxu0 %v2142_v3 }
 0x5d7   : > { %v977_v2 = vsel %vm640_vm1, %v972_v63, 0.0  ;;  %1940 = vmatprep.subr.bf16.mxu0 %v2480_v0 }
 0x5d8   : > { %978 = vadd.xlane.f32.xlu0 %v977_v2  ;;  %v974_v4 = vpop.f32.mrf.mxu1 }
 0x5da   : > { %v1937_v5 = vpop.f32.mrf.mxu1  ;;  %1941 = vmatpush3.bf16.msra.mxu0 %v2143_v16 }
 0x5db   : > { %1954 = vmatprep.subr.bf16.mxu0 %v2480_v0 }
 0x5dc   : > { %v1129_v32 = vpop.f32.mrf.mxu1 }
 0x5de   : > { %v1952_v33 = vpop.f32.mrf.mxu1 }
 0x5e0   : > { %v1132_v34 = vpop.f32.mrf.mxu1 }
 0x5e1   : > { %v1144_v35 = vpack.c.bf16 %v1132_v34, %v1129_v32 }
 0x5e2   : > { %v1953_v36 = vpop.f32.mrf.mxu1 }
 0x5e3   : > { %v1149_v37 = vsel %vm696_vm2, %v1144_v35, 0 }
 0x5ee   : > { %1253 = vrot.lane.b32.xlu0 %v1144_v35, %s2483_s16 }
 0x661   : > { %v979_v6 = vpop.xlane.xlu0 %978 }
 0x662   : > { %v981_v7 = vmul.f32 0.03125, %v979_v6 }
 0x664   : > { %v982_v8 = vsub.f32 %v972_v63, %v981_v7 }
 0x665   : > { %v1254_v39 = vpop.permute.xlu0 %1253 }
 0x666   : > { %v983_v9 = vmul.f32 %v982_v8, %v982_v8  ;;  %v1004_v26 = vmul.f32 %v1827_v25, %v982_v8  ;;  %v1259_v43 = vsel %vm696_vm2, %v1254_v39, 0  ;;  %v2146_v39 = vld [vmem:[%s2921_s11 + $0x8] sm:$0xff]  }
 0x668   : > { %v984_v10 = vsel %vm640_vm1, %v983_v9, 0.0 }
 0x669   : > { %985 = vadd.xlane.f32.xlu1 %v984_v10 }
 0x6f2   : > { %v986_v17 = vpop.xlane.xlu1 %985 }
 0x6f3   : > { %v988_v18 = vmul.f32 0.032258064, %v986_v17 }
 0x6f5   : > { %2160 = vrsqrt.f32 %v988_v18  ;;  %vm991_vm5 = vcmp.eq.f32.partialorder %v988_v18, inf  ;;  %v994_v21 = vand.u32 2147483648, %v988_v18  ;;  %vm993_vm6 = vcmp.eq.f32.partialorder %v988_v18, 0.0 }
 0x702   : > { %v2161_v19 = vpop.eup %2160 }
 0x703   : > { %v990_v20 = vmul.f32 %v2161_v19, %v988_v18  ;;  %v2145_v19 = vld [vmem:[#allocation13] sm:$0xff]  }
 0x705   : > { %v992_v22 = vsel %vm991_vm5, %v988_v18, %v990_v20 }
 0x706   : > { %v995_v23 = vsel %vm993_vm6, %v994_v21, %v992_v22 }
 0x707   : > { %v996_v24 = vadd.f32 1e-09, %v995_v23 }
 0x709   : > { %2162 = vrcp.f32 %v996_v24 }
 0x716   : > { %v2163_v27 = vpop.eup %2162 }
 0x717   : > { %v1005_v29 = vmul.f32 %v2163_v27, %v1004_v26 }
 0x719   : > { %v2798_v30 = vadd.f32 %v1828_v28, %v1005_v29 }
 0x71b   : > { %v1016_v31 = vpack.c.bf16 %v2798_v30, %v2798_v30 }
 0x71d   : > { %1943 = vmatmul.mubr.msk.bf16.vlgmr.msra.gmra.mxu0 %vm640_vm1, %v1016_v31 }
 0x71e   : > { %1956 = vmatprep.mubr.msk.bf16.mxu0 %vm2481_vm0, %v2480_v0  ;;  %1955 = vmatpush3.bf16.xpose.msra.mxu0 %v1149_v37 }
 0x71f   : > { %1966 = vmatprep.subr.bf16.mxu0 %v2480_v0 }
 0x7dd   : > { %v1070_v38 = vpop.f32.mrf.mxu0 }
 0x7de   : > { %v1142_v40 = vmul.f32 0.17677669, %v1070_v38 }
 0x7df   : > { %v1944_v41 = vpop.f32.mrf.mxu0 }
 0x7e0   : > { %v1143_v42 = vpack.c.bf16 %v1142_v40, %v1142_v40  ;;  %v2148_v40 = vld [vmem:[%s2922_s12 + $0x18] sm:$0xff]   ;;  %v2149_v41 = vld [vmem:[%s2922_s12 + $0x10] sm:$0xff]  }
 0x7e1   : > { %v1073_v44 = vpop.f32.mrf.mxu0 }
 0x7e2   : > { %1251 = vrot.lane.b32.xlu1 %v1143_v42, %s2483_s16  ;;  %1957 = vmatmul.mubr.msk.bf16.vlgmr.msra.gmra.mxu0 %vm696_vm2, %v1143_v42  ;;  %v2150_v42 = vld [vmem:[%s2922_s12 + $0x8] sm:$0xff]  }
 0x7e3   : > { %v1945_v45 = vpop.f32.mrf.mxu0  ;;  %1967 = vmatpush3.bf16.xpose.msra.mxu0 %v1259_v43  ;;  %1968 = vmatprep.mubr.msk.bf16.mxu0 %vm2481_vm0, %v2480_v0 }
 0x7e4   : > { %1978 = vmatprep.subr.bf16.mxu0 %v2480_v0 }
 0x854   : > { %v1252_v46 = vpop.permute.xlu1 %1251 }
 0x855   : > { %1969 = vmatmul.mubr.msk.bf16.vlgmr.msra.gmra.mxu0 %vm696_vm2, %v1252_v46 }
 0x856   : > { %1982 = vmatprep.mubr.msk.bf16.mxu0 %vm2481_vm0, %v2480_v0  ;;  %1979 = vmatpush3.bf16.msra.mxu0 %v2144_v14 }
 0x857   : > { %1980 = vmatprep.subr.bf16.mxu0 %v2480_v0 }
 0x85a   : > { %1981 = vmatpush3.bf16.msra.mxu0 %v2145_v19 }
 0x85b   : > { %1994 = vmatprep.subr.bf16.mxu0 %v2480_v0 }
 0x8a2   : > { %v1185_v47 = vpop.f32.mrf.mxu0 }
 0x8a3   : > { %v1191_v48 = vsel %vm696_vm2, %v1185_v47, -inf }
 0x8a4   : > { %1192 = vmax.xlane.f32.xlu0 %v1191_v48  ;;  %v1958_v49 = vpop.f32.mrf.mxu0 }
 0x8a6   : > { %v1188_v50 = vpop.f32.mrf.mxu0 }
 0x8a8   : > { %v1959_v51 = vpop.f32.mrf.mxu0 }
 0x8a9   : > { %v1842_v51 = vld [vmem:[#allocation14] ss:$0 sm:$0xff] }
 0x915   : > { %v1295_v52 = vpop.f32.mrf.mxu0 }
 0x916   : > { %v1301_v53 = vsel %vm696_vm2, %v1295_v52, -inf }
 0x917   : > { %1302 = vmax.xlane.f32.xlu1 %v1301_v53  ;;  %v1970_v54 = vpop.f32.mrf.mxu0 }
 0x918   : > { %v1843_v54 = vld [vmem:[%s2920_s10] ss:$0 sm:$0xff] }
 0x919   : > { %v1298_v55 = vpop.f32.mrf.mxu0 }
 0x91b   : > { %v1971_v56 = vpop.f32.mrf.mxu0 }
 0x928   : > { %1204 = vrot.lane.b32.xlu1 %v1144_v35, %s2482_s21  ;;  %s2488_s21 = smov [#allocation16]  }
 0x929   : > { %s2392_s16 = sshll.u32 %s2488_s21, 4  ;;  %s2393_s16 = int_to_ptr.vmem [resolvable:$false] %s2392_s16 }
 0x92a   : > { %s2394_s22 = scalar_lea.vmem %s2393_s16, 256 }
 0x92d   : > { %v1193_v57 = vpop.xlane.xlu0 %1192 }
 0x92e   : > { %v1194_v58 = vsub.f32 %v1185_v47, %v1193_v57  ;;  %v2151_v57 = vld [vmem:[%s2922_s12] sm:$0xff]  }
 0x930   : > { %v1195_v59 = vmul.f32 1.442695, %v1194_v58 }
 0x932   : > { %2164 = vpow2.f32 %v1195_v59 }
 0x93f   : > { %v2165_v60 = vpop.eup %2164 }
 0x940   : > { %v1197_v61 = vsel %vm696_vm2, %v2165_v60, 0.0 }
 0x941   : > { %1198 = vadd.xlane.f32.xlu0 %v1197_v61 }
 0x9a0   : > { %v1303_v62 = vpop.xlane.xlu1 %1302 }
 0x9a1   : > { %v1304_v63 = vsub.f32 %v1295_v52, %v1303_v62 }
 0x9a3   : > { %v1305_v1 = vmul.f32 1.442695, %v1304_v63 }
 0x9a4   : > { %v1205_v2 = vpop.permute.xlu1 %1204 }
 0x9a5   : > { %2166 = vpow2.f32 %v1305_v1  ;;  %1961 = vmatpush3.bf16.msra.mxu1 %v1205_v2 }
 0x9a6   : > { %1972 = vmatprep.subr.bf16.mxu1 %v2480_v0 }
 0x9b2   : > { %v2167_v4 = vpop.eup %2166 }
 0x9b3   : > { %v1307_v5 = vsel %vm696_vm2, %v2167_v4, 0.0 }
 0x9b4   : > { %1308 = vadd.xlane.f32.xlu0 %v1307_v5 }
 0x9ca   : > { %v1199_v6 = vpop.xlane.xlu0 %1198  ;;  %1313 = vrot.lane.b32.xlu0 %v1144_v35, %s2484_s26  ;;  %s2963_s26 = sld [smem:[#allocation29_spill]] }
 0x9cb   : > { %2168 = vrcp.f32 %v1199_v6 }
 0x9d8   : > { %v2169_v7 = vpop.eup %2168 }
 0x9d9   : > { %v1201_v8 = vmul.f32 %v2169_v7, %v2165_v60 }
 0x9db   : > { %v1202_v9 = vpack.c.bf16 %v1201_v8, %v1201_v8 }
 0x9dd   : > { %1963 = vmatmul.mubr.msk.bf16.vlgmr.msra.gmra.mxu1 %vm696_vm2, %v1202_v9 }
 0x9de   : > { %1974 = vmatprep.mubr.msk.bf16.mxu1 %vm2481_vm0, %v2480_v0 }
 0xa3d   : > { %v1309_v10 = vpop.xlane.xlu0 %1308 }
 0xa3e   : > { %2170 = vrcp.f32 %v1309_v10 }
 0xa41   : > { %v1314_v11 = vpop.permute.xlu0 %1313 }
 0xa42   : > { %1973 = vmatpush3.bf16.msra.mxu1 %v1314_v11 }
 0xa43   : > { %1986 = vmatprep.subr.bf16.mxu1 %v2480_v0 }
 0xa4b   : > { %v2171_v12 = vpop.eup %2170 }
 0xa4c   : > { %v1311_v3 = vmul.f32 %v2171_v12, %v2167_v4 }
 0xa4e   : > { %v1312_v13 = vpack.c.bf16 %v1311_v3, %v1311_v3 }
 0xa50   : > { %1975 = vmatmul.mubr.msk.bf16.vlgmr.msra.gmra.mxu1 %vm696_vm2, %v1312_v13 }
 0xa51   : > { %1990 = vmatprep.mubr.msk.bf16.mxu1 %vm2481_vm0, %v2480_v0  ;;  %1987 = vmatpush3.bf16.msra.mxu1 %v2146_v39 }
 0xa52   : > { %1988 = vmatprep.subr.bf16.mxu1 %v2480_v0 }
 0xa9d   : > { %v1244_v15 = vpop.f32.mrf.mxu1 }
 0xa9f   : > { %v1964_v16 = vpop.f32.mrf.mxu1 }
 0xaa1   : > { %v1247_v17 = vpop.f32.mrf.mxu1 }
 0xaa3   : > { %v1965_v18 = vpop.f32.mrf.mxu1 }
 0xb10   : > { %v1353_v20 = vpop.f32.mrf.mxu1 }
 0xb11   : > { %1360 = vrot.lane.b32.xlu1 %v1353_v20, %s2487_s20  ;;  %v1852_v20 = vld [vmem:[%s2923_s13] ss:$0 sm:$0xff]  ;;  %s1643_s20 = sshll.u32 %s611_s29, 4  ;;  %s1644_s20 = int_to_ptr.vmem [resolvable:$true] %s1643_s20 }
 0xb12   : > { %v1976_v21 = vpop.f32.mrf.mxu1  ;;  %s2388_s18 = scalar_lea.vmem %s1644_s20, 128  ;;  %p2395_p13 = scmp.lt.s32.totalorder %s1644_s20, %s2393_s16 }
 0xb13   : > { %p2389_p8 = scmp.ne.s32.totalorder %s1644_s20, %s2388_s18  ;;  %p2396_p5 = scmp.lt.s32.totalorder %s2394_s22, %s2388_s18 }
 0xb14   : > { %v1356_v22 = vpop.f32.mrf.mxu1 }
 0xb15   : > { %p2390_p0 = pnand %p2389_p8, %p2965_p11  ;;  %p2397_p6 = por %p2396_p5, %p2395_p13 }
 0xb16   : > { %v1977_v23 = vpop.f32.mrf.mxu1 }
 0xb17   : > { %v1853_v23 = vld [vmem:[%s2963_s26] ss:$0 sm:$0xff]  ;;  %p2391_p9 = pneg %p2390_p0 }
 0xb19   : > { %p2398_p10 = pnand %p2397_p6, %p2391_p9 }
 0xb83   : > { %v1361_v24 = vpop.permute.xlu1 %1360 }
 0xb84   : > { %v1363_v25 = vsel %vm696_vm2, %v1244_v15, %v1361_v24 }
 0xb85   : > { %v1364_v26 = vpack.c.bf16 %v1363_v25, %v1363_v25 }
 0xb87   : > { %1983 = vmatmul.mubr.msk.bf16.vlgmr.msra.gmra.mxu0 %vm640_vm1, %v1364_v26 }
 0xb88   : > { %2002 = vmatprep.mubr.msk.bf16.mxu0 %vm2481_vm0, %v2480_v0  ;;  %1995 = vmatpush3.bf16.msra.mxu0 %v2148_v40 }
 0xb89   : > { %1996 = vmatprep.subr.bf16.mxu0 %v2480_v0 }
 0xb8c   : > { %1997 = vmatpush3.bf16.msra.mxu0 %v2149_v41 }
 0xb8d   : > { %1998 = vmatprep.subr.bf16.mxu0 %v2480_v0 }
 0xb90   : > { %1999 = vmatpush3.bf16.msra.mxu0 %v2150_v42 }
 0xb91   : > { %2000 = vmatprep.subr.bf16.mxu0 %v2480_v0 }
 0xb94   : > { %2001 = vmatpush3.bf16.msra.mxu0 %v2151_v57 }
 0xc47   : > { %v1414_v27 = vpop.f32.mrf.mxu0 }
 0xc48   : > { %v1415_v28 = vadd.f32 %v1414_v27, %v2798_v30  ;;  %v2147_v30 = vld [vmem:[%s2921_s11] sm:$0xff]  }
 0xc49   : > { %v1984_v29 = vpop.f32.mrf.mxu0  ;;  %1989 = vmatpush3.bf16.msra.mxu1 %v2147_v30 }
 0xc4a   : > { %v1420_v31 = vsel %vm640_vm1, %v1415_v28, 0.0 }
 0xc4b   : > { %1421 = vadd.xlane.f32.xlu1 %v1420_v31  ;;  %v1417_v32 = vpop.f32.mrf.mxu0 }
 0xc4d   : > { %v1985_v33 = vpop.f32.mrf.mxu0 }
 0xcd4   : > { %v1422_v34 = vpop.xlane.xlu1 %1421 }
 0xcd5   : > { %v1423_v35 = vmul.f32 0.03125, %v1422_v34 }
 0xcd7   : > { %v1424_v36 = vsub.f32 %v1415_v28, %v1423_v35 }
 0xcd9   : > { %v1425_v37 = vmul.f32 %v1424_v36, %v1424_v36  ;;  %v1445_v52 = vmul.f32 %v1842_v51, %v1424_v36 }
 0xcdb   : > { %v1426_v38 = vsel %vm640_vm1, %v1425_v37, 0.0 }
 0xcdc   : > { %1427 = vadd.xlane.f32.xlu0 %v1426_v38 }
 0xd65   : > { %v1428_v43 = vpop.xlane.xlu0 %1427 }
 0xd66   : > { %v1429_v44 = vmul.f32 0.032258064, %v1428_v43 }
 0xd68   : > { %2172 = vrsqrt.f32 %v1429_v44  ;;  %vm1432_vm7 = vcmp.eq.f32.partialorder %v1429_v44, inf  ;;  %v1435_v47 = vand.u32 2147483648, %v1429_v44  ;;  %vm1434_vm8 = vcmp.eq.f32.partialorder %v1429_v44, 0.0 }
 0xd75   : > { %v2173_v45 = vpop.eup %2172 }
 0xd76   : > { %v1431_v46 = vmul.f32 %v2173_v45, %v1429_v44 }
 0xd78   : > { %v1433_v48 = vsel %vm1432_vm7, %v1429_v44, %v1431_v46 }
 0xd79   : > { %v1436_v49 = vsel %vm1434_vm8, %v1435_v47, %v1433_v48 }
 0xd7a   : > { %v1437_v50 = vadd.f32 1e-09, %v1436_v49 }
 0xd7c   : > { %2174 = vrcp.f32 %v1437_v50 }
 0xd89   : > { %v2175_v53 = vpop.eup %2174 }
 0xd8a   : > { %v1446_v0 = vmul.f32 %v2175_v53, %v1445_v52 }
 0xd8c   : > { %v1453_v55 = vadd.f32 %v1843_v54, %v1446_v0 }
 0xd8e   : > { %v1454_v56 = vpack.c.bf16 %v1453_v55, %v1453_v55 }
 0xd90   : > { %1991 = vmatmul.mubr.msk.bf16.vlgmr.msra.gmra.mxu1 %vm640_vm1, %v1454_v56 }
 0xe50   : > { %v1508_v58 = vpop.f32.mrf.mxu1 }
 0xe51   : > { %v1514_v59 = vmax.f32 %v1508_v58, 0.0 }
 0xe52   : > { %v1992_v60 = vpop.f32.mrf.mxu1 }
 0xe53   : > { %v1515_v61 = vpack.c.bf16 %v1514_v59, %v1514_v59 }
 0xe54   : > { %v1511_v62 = vpop.f32.mrf.mxu1 }
 0xe55   : > { %2003 = vmatmul.mubr.msk.bf16.vlgmr.msra.gmra.mxu0 %vm1548_vm9, %v1515_v61 }
 0xe56   : > { %v1993_v63 = vpop.f32.mrf.mxu1 }
 0xf15   : > { %v1586_v1 = vpop.f32.mrf.mxu0 }
 0xf16   : > { %v1587_v2 = vadd.f32 %v1586_v1, %v1453_v55 }
 0xf17   : > { %v2004_v4 = vpop.f32.mrf.mxu0 }
 0xf18   : > { %v1594_v5 = vsel %vm640_vm1, %v1587_v2, 0.0 }
 0xf19   : > { %1595 = vadd.xlane.f32.xlu0 %v1594_v5  ;;  %v1589_v6 = vpop.f32.mrf.mxu0 }
 0xf1b   : > { %v2005_v7 = vpop.f32.mrf.mxu0 }
 0xfa2   : > { %v1596_v8 = vpop.xlane.xlu0 %1595 }
 0xfa3   : > { %v1597_v9 = vmul.f32 0.03125, %v1596_v8 }
 0xfa5   : > { %v1598_v10 = vsub.f32 %v1587_v2, %v1597_v9 }
 0xfa7   : > { %v1599_v11 = vmul.f32 %v1598_v10, %v1598_v10  ;;  %v1619_v21 = vmul.f32 %v1852_v20, %v1598_v10 }
 0xfa9   : > { %v1600_v12 = vsel %vm640_vm1, %v1599_v11, 0.0 }
 0xfaa   : > { %1601 = vadd.xlane.f32.xlu1 %v1600_v12 }
0x1033   : > { %v1602_v3 = vpop.xlane.xlu1 %1601 }
0x1034   : > { %v1603_v13 = vmul.f32 0.032258064, %v1602_v3 }
0x1036   : > { %2176 = vrsqrt.f32 %v1603_v13  ;;  %vm1606_vm10 = vcmp.eq.f32.partialorder %v1603_v13, inf  ;;  %v1609_v16 = vand.u32 2147483648, %v1603_v13  ;;  %vm1608_vm11 = vcmp.eq.f32.partialorder %v1603_v13, 0.0 }
0x1043   : > { %v2177_v14 = vpop.eup %2176 }
0x1044   : > { %v1605_v15 = vmul.f32 %v2177_v14, %v1603_v13 }
0x1046   : > { %v1607_v17 = vsel %vm1606_vm10, %v1603_v13, %v1605_v15 }
0x1047   : > { %v1610_v18 = vsel %vm1608_vm11, %v1609_v16, %v1607_v17 }
0x1048   : > { %v1611_v19 = vadd.f32 1e-09, %v1610_v18 }
0x104a   : > { %2178 = vrcp.f32 %v1611_v19 }
0x1057   : > { %v2179_v22 = vpop.eup %2178 }
0x1058   : > { %v1620_v24 = vmul.f32 %v2179_v22, %v1619_v21 }
0x105a   : > { %v1627_v25 = vadd.f32 %v1853_v23, %v1620_v24 }
0x105c   : > { %1628 = vst.msk [vmem:[%s611_s29] sm:$0xff] %vm640_vm1, %v1627_v25 }
0x105d   : > { %2401 = shalt.err (!%p2398_p10)
}
0x105e   : > { %s2402_s23 = scalar_lea.hbm %s1641_s30, 128  ;;  %s2406_s17 = scalar_lea.hbm %s2964_s15, 256 }
0x105f   : > { %p2403_p12 = scmp.ne.s32.totalorder %s1641_s30, %s2402_s23  ;;  %p2407_p3 = scmp.lt.s32.totalorder %s1641_s30, %s2964_s15 }
0x1060   : > { %p2408_p4 = scmp.lt.s32.totalorder %s2406_s17, %s2402_s23 }
0x1061   : > { %p2404_p1 = pnand %p2403_p12, %p2965_p11 }
0x1062   : > { %p2409_p7 = por %p2408_p4, %p2407_p3 }
0x1063   : > { %p2405_p2 = pneg %p2404_p1 }
0x1065   : > { %p2410_p8 = pnand %p2409_p7, %p2405_p2 }
0x1067   : > { %2413 = shalt.err (!%p2410_p8)
}
0x1068   : > { %2038 = dma.vmem_to_hbm [thread:$0]  (%p2965_p11), %s1644_s20, 128, %s1641_s30, %s1630_s27  }
0x1069 PF: > { %s2966_s14 = sld [smem:[#allocation25_spill]] }
0x106a   : > { %s2967_s18 = sld [smem:[#allocation23_spill]] }
0x106b   : > { %s2968_s21 = sld [smem:[#allocation28_spill]] }
0x106f   : > { %p2085_p0 = scmp.ge.s32.totalorder %s2966_s14, 2 }
0x1070   : > { %s1655_s16 = sand.u32 1, %s2967_s18  }
0x1071   : > { %p2969_p9 = scmp.ne.s32.totalorder %s2968_s21, 0  ;;  %s1656_s22 = scalar_lea.sflag [#allocation4], %s1655_s16 }
0x1073   : > { %p2066_p13 = pnand %p2085_p0, %p2969_p9 }
0x1075   : > { %p2067_p5 = pneg %p2066_p13 }
0x1077   : > { %2451 = dma.done.wait (%p2067_p5), %s1656_s22, 128  }
0x1078   : > { %2453 = vsyncadd (%p2067_p5), %s1656_s22, 4294967168  ;;  %s2970_s21 = sld [smem:[#allocation26_spill]]  ;;  %s2973_s18 = smov %s2460_s19 }
0x1079   : > { %s2971_s23 = sld [smem:[#allocation24_spill]] }
0x107a   : > { %s2972_s20 = sld [smem:[#allocation27_spill]] }
0x107e   : > { %p30_p6 = scmp.ge.s32.totalorder %s2970_s21, 4  }
0x107f   : > { %s2974_s19 = smov %s2971_s23 }
0x1080   :  { %32 = sbr.rel (!%p30_p6) target bundleno = 11 (0xb), region = 151 }
0x1085   :  { %1661 = vsyncpa [#allocation3], 1 }
0x1086   :  { %1663 = vsyncpa [#allocation3 + $0x1], 1 }
0x1087   :  { %1664 = vsyncpa [#allocation6], 1 }
0x1088   :  { %1665 = vsyncpa [#allocation9], 1 }
0x1089   :  { %1666 = vsyncpa [#allocation12], 1 }
0x108a   :  { %1667 = vsyncpa [#allocation15], 1 }
0x108b   :  { %1668 = vsyncpa [#allocation4], 1 }
0x108c   :  { %1670 = vsyncpa [#allocation4 + $0x1], 1 }

</bundles_post_ra>
